<compile_context>
chip_gen: v7x
topology: tpu7x:2x2x1
jax: 0.10.0
libtpu: 0.0.40
codegen_flags: <defaults>
</compile_context>

<pallas_src>
import functools
import math

import jax
import jax.numpy as jnp
from jax.experimental import pallas as pl
from jax.experimental.pallas import tpu as pltpu

# ----------------------------- synthetic cfg --------------------------------
CFG = dict(
    parts='hand',
    input_img_shape=(64, 64),    # (H, W)
    output_hm_shape=(8, 8, 8),   # (D, H, W)
    focal=(5000.0, 5000.0),
    princpt=(32.0, 32.0),
    camera_3d_size=0.3,
)

FEAT_DIM = 64
JOINT_NUM = 21                    # MANO joint set regressed from the mesh
JOINT_PAD = 24                    # padded to a multiple of 8 inside kernels
HM_D, HM_H, HM_W = CFG['output_hm_shape']
HM_S = HM_H * HM_W                # 64
H_IMG, W_IMG = CFG['input_img_shape']
POOL_H, POOL_W = H_IMG // HM_H, W_IMG // HM_W      # 8, 8
PATCH = 3 * POOL_H * POOL_W                        # 192
MANO_ORIG_JOINT_NUM = 16          # root + 15 hand joints
MANO_V = 64                       # synthetic MANO vertex count
MANO_ROOT_IDX = 0
MANO_PARENTS = (-1, 0, 1, 2, 0, 4, 5, 0, 7, 8, 0, 10, 11, 0, 13, 14)

RN_IN_PAD = FEAT_DIM + 3 * JOINT_PAD                      # 136
RN_OUT = 6 + (MANO_ORIG_JOINT_NUM - 1) * 6 + 10 + 3       # 109
RN_OUT_PAD = 128
AUG_OUT = 256                     # [rn_out(128 padded) | x(24) | y(24) | z(24) | 0...]
BLEND_IN = 10 + (MANO_ORIG_JOINT_NUM - 1) * 9             # 145
BLEND_OUT = MANO_V * 3 + MANO_ORIG_JOINT_NUM * 3          # 240

# TODO(synk): only cfg.parts == 'hand', mode == 'test' is implemented.
# TODO(synk): real MANO assets (template/shapedirs/J_regressor) are replaced by
#             deterministic synthetic tensors of the same structure (no .pt load).


# ============================= Pallas kernels ================================
def _vision_head_kernel(patch_ref, bbw_ref, bbb_ref, pnw_ref, pnb_ref,
                        wsum_ref, wmean_ref, wd_ref, wa_ref, ba_ref,
                        out_ref, *, bpb):
    """Fused avg-pool + backbone 1x1 conv + ReLU + position-net 1x1 conv +
    3D soft-argmax + rotation-net FC.  Batch folded into sublanes."""
    # (1) 8x8 avg-pool fused into the conv weight: one (bpb*HM_S,192)x(192,64) matmul
    feat = jnp.maximum(
        jnp.dot(patch_ref[...], bbw_ref[...], preferred_element_type=jnp.float32)
        + bbb_ref[...], 0.0)                                     # (bpb*HM_S, FEAT)

    # (2) position net: ONE stacked matmul over all joints & depth slices
    hm = (jnp.dot(feat, pnw_ref[...], preferred_element_type=jnp.float32)
          + pnb_ref[...])                                        # (bpb*HM_S, JOINT_PAD*HM_D)

    # (3) 3D soft-argmax. A single block-wide max is an exact softmax shift
    #     (softmax is invariant to any per-(batch, joint) constant).
    m = jnp.max(hm, axis=1, keepdims=True)
    m = jnp.max(m, axis=0, keepdims=True)                        # (1, 1)
    e = jnp.exp(hm - m)                                          # (128, 192), EUP, lane-dense

    # per-batch spatial sums with weights {1, x, y}  -> MXU (constant left matrix)
    s1 = jnp.dot(wsum_ref[...], e, preferred_element_type=jnp.float32)    # (3*bpb, 192)
    # per-joint depth sums with weights {1, d}       -> MXU (constant right matrix)
    s2 = jnp.dot(s1, wd_ref[...], preferred_element_type=jnp.float32)     # (3*bpb, 2*JOINT_PAD)
    # mean-pooled backbone feature per batch         -> MXU
    pf = jnp.dot(wmean_ref[...], feat, preferred_element_type=jnp.float32)  # (bpb, FEAT)

    # (4) assemble rotation-net input rows (lane-dense) and run the FC.
    #     The augmented weight also carries x/y/z straight through to lanes
    #     128..199 of the output, so joints need no separate (masked) store.
    rows = []
    for b in range(bpb):
        denom = s2[3 * b:3 * b + 1, :JOINT_PAD]
        inv = pl.reciprocal(denom, approx=False)                 # exact (review note)
        x = s2[3 * b + 1:3 * b + 2, :JOINT_PAD] * inv
        y = s2[3 * b + 2:3 * b + 3, :JOINT_PAD] * inv
        z = s2[3 * b:3 * b + 1, JOINT_PAD:2 * JOINT_PAD] * inv
        rows.append(jnp.concatenate([pf[b:b + 1, :], x, y, z], axis=1))   # (1, RN_IN_PAD)
    rn_in = jnp.concatenate(rows, axis=0)                        # (bpb, RN_IN_PAD)
    out_ref[...] = (jnp.dot(rn_in, wa_ref[...], preferred_element_type=jnp.float32)
                    + ba_ref[...])                               # (bpb, AUG_OUT)


def pallas_vision_head(params, img):
    """img: NCHW (B, 3, H, W) -> joint_img (B, 21, 3), rn_out (B, RN_OUT)."""
    B = img.shape[0]
    # pool-patch-major layout: rows=(b, hmH, hmW), lanes=(c, dh, dw)
    patches = (img.astype(jnp.float32)
               .reshape(B, 3, HM_H, POOL_H, HM_W, POOL_W)
               .transpose(0, 2, 4, 1, 3, 5)
               .reshape(B * HM_S, PATCH))

    # batches per block: engages both TCs on v7x for large batches, single
    # block (grid=(1,)) for the small-batch case on v5e/v6e.
    bpb = 8 if (B % 8 == 0) else B
    grid = (B // bpb,)

    # constant reduction matrices (traced constants, folded by XLA under jit)
    s = jnp.arange(HM_S)
    wrow = jnp.stack([jnp.ones((HM_S,), jnp.float32),
                      (s % HM_W).astype(jnp.float32),
                      (s // HM_W).astype(jnp.float32)], axis=0)          # (3, HM_S)
    eye_b = jnp.eye(bpb, dtype=jnp.float32)
    wsum = jnp.kron(eye_b, wrow)                                         # (3*bpb, bpb*HM_S)
    wmean = jnp.kron(eye_b, jnp.full((1, HM_S), 1.0 / HM_S, jnp.float32))  # (bpb, bpb*HM_S)

    out = pl.pallas_call(
        functools.partial(_vision_head_kernel, bpb=bpb),
        out_shape=jax.ShapeDtypeStruct((B, AUG_OUT), jnp.float32),
        grid=grid,
        in_specs=[
            pl.BlockSpec((bpb * HM_S, PATCH), lambda g: (g, 0)),
            pl.BlockSpec((PATCH, FEAT_DIM), lambda g: (0, 0)),
            pl.BlockSpec((1, FEAT_DIM), lambda g: (0, 0)),
            pl.BlockSpec((FEAT_DIM, JOINT_PAD * HM_D), lambda g: (0, 0)),
            pl.BlockSpec((1, JOINT_PAD * HM_D), lambda g: (0, 0)),
            pl.BlockSpec((3 * bpb, bpb * HM_S), lambda g: (0, 0)),
            pl.BlockSpec((bpb, bpb * HM_S), lambda g: (0, 0)),
            pl.BlockSpec((JOINT_PAD * HM_D, 2 * JOINT_PAD), lambda g: (0, 0)),
            pl.BlockSpec((RN_IN_PAD, AUG_OUT), lambda g: (0, 0)),
            pl.BlockSpec((1, AUG_OUT), lambda g: (0, 0)),
        ],
        out_specs=pl.BlockSpec((bpb, AUG_OUT), lambda g: (g, 0)),
        compiler_params=pltpu.CompilerParams(dimension_semantics=("parallel",)),
    )(patches, params['bb_pool_w'], params['bb_b'], params['pn_w'], params['pn_b'],
      wsum, wmean, params['wd'], params['rn_aug_w'], params['rn_aug_b'])

    rn_out = out[:, :RN_OUT]
    jx = out[:, RN_OUT_PAD:RN_OUT_PAD + JOINT_NUM]
    jy = out[:, RN_OUT_PAD + JOINT_PAD:RN_OUT_PAD + JOINT_PAD + JOINT_NUM]
    jz = out[:, RN_OUT_PAD + 2 * JOINT_PAD:RN_OUT_PAD + 2 * JOINT_PAD + JOINT_NUM]
    joint_img = jnp.stack([jx, jy, jz], axis=-1)                 # (B, 21, 3)
    return joint_img, rn_out


def _mano_blend_kernel(bp_ref, w_ref, b_ref, out_ref):
    """MANO shape+pose blend shapes and rest-joint regression: ONE matmul."""
    out_ref[...] = (jnp.dot(bp_ref[...], w_ref[...],
                            preferred_element_type=jnp.float32) + b_ref[...])


def pallas_mano_blend(params, betas, pose_feature):
    B = betas.shape[0]
    bp = jnp.concatenate([betas, pose_feature], axis=1).astype(jnp.float32)  # (B, 145)
    out = pl.pallas_call(
        _mano_blend_kernel,
        out_shape=jax.ShapeDtypeStruct((B, BLEND_OUT), jnp.float32),
    )(bp, params['blend_w'], params['blend_b'])
    return out[:, :MANO_V * 3], out[:, MANO_V * 3:]              # v_posed_flat, j_flat


def _regress_project_kernel(mesh_ref, t_ref, wreg_ref,
                            jproj_ref, jcam_ref, mesh_out_ref):
    """Mesh->joint regression, camera projection (single reciprocal, folded
    constants), root centering, in-kernel mesh translation."""
    J = JOINT_NUM
    fx, fy = CFG['focal']
    cx, cy = CFG['princpt']
    sx = fx / W_IMG * HM_W
    sy = fy / H_IMG * HM_H
    ox = cx / W_IMG * HM_W
    oy = cy / H_IMG * HM_H

    mesh = mesh_ref[...]                                         # (B, V*3)
    jcm = jnp.dot(mesh, wreg_ref[...],
                  preferred_element_type=jnp.float32)            # (B, 3*J): [x|y|z]
    jx = jcm[:, 0:J]
    jy = jcm[:, J:2 * J]
    jz = jcm[:, 2 * J:3 * J]
    t = t_ref[...]                                               # (B, 3)
    tx = t[:, 0:1]
    ty = t[:, 1:2]
    tz = t[:, 2:3]
    inv = pl.reciprocal(jz + tz + 1e-4, approx=False)            # one reciprocal for x & y
    px = (jx + tx) * inv * sx + ox
    py = (jy + ty) * inv * sy + oy
    jproj_ref[...] = jnp.concatenate([px, py], axis=1)           # (B, 2*J)

    rx = jx[:, MANO_ROOT_IDX:MANO_ROOT_IDX + 1]
    ry = jy[:, MANO_ROOT_IDX:MANO_ROOT_IDX + 1]
    rz = jz[:, MANO_ROOT_IDX:MANO_ROOT_IDX + 1]
    jcam_ref[...] = jnp.concatenate([jx - rx, jy - ry, jz - rz], axis=1)  # (B, 3*J)

    # tile cam_trans across vertices in-kernel (no host jnp.tile / extra input)
    lane = jax.lax.broadcasted_iota(jnp.int32, mesh.shape, 1)
    c = lane % 3
    t_tiled = jnp.where(c == 0, tx, jnp.where(c == 1, ty, tz))
    mesh_out_ref[...] = mesh + t_tiled                           # (B, V*3)


def pallas_regress_project(params, mesh_flat, cam_trans):
    B = mesh_flat.shape[0]
    return pl.pallas_call(
        _regress_project_kernel,
        out_shape=(jax.ShapeDtypeStruct((B, 2 * JOINT_NUM), jnp.float32),
                   jax.ShapeDtypeStruct((B, 3 * JOINT_NUM), jnp.float32),
                   jax.ShapeDtypeStruct((B, MANO_V * 3), jnp.float32)),
    )(mesh_flat.astype(jnp.float32), cam_trans.astype(jnp.float32),
      params['joint_reg_kron_cm'])


# --------------------------- plain-JAX glue ----------------------------------
def get_camera_trans(cam_param):
    t_xy = cam_param[:, :2]
    gamma = jax.nn.sigmoid(cam_param[:, 2])
    k_value = math.sqrt(CFG['focal'][0] * CFG['focal'][1] *
                        CFG['camera_3d_size'] ** 2 /
                        (CFG['input_img_shape'][0] * CFG['input_img_shape'][1]))
    t_z = k_value * gamma
    return jnp.concatenate([t_xy, t_z[:, None]], axis=1)


def rot6d_to_axis_angle(x):
    """x: (N, 6) -> axis-angle (N, 3)."""
    x = x.reshape(-1, 3, 2)
    a1, a2 = x[:, :, 0], x[:, :, 1]
    b1 = a1 / (jnp.linalg.norm(a1, axis=1, keepdims=True) + 1e-8)
    b2 = a2 - jnp.sum(b1 * a2, axis=1, keepdims=True) * b1
    b2 = b2 / (jnp.linalg.norm(b2, axis=1, keepdims=True) + 1e-8)
    b3 = jnp.cross(b1, b2)
    R = jnp.stack([b1, b2, b3], axis=-1)
    cos = jnp.clip((R[:, 0, 0] + R[:, 1, 1] + R[:, 2, 2] - 1.0) / 2.0,
                   -1.0 + 1e-6, 1.0 - 1e-6)
    angle = jnp.arccos(cos)
    sin = jnp.sin(angle)
    axis = jnp.stack([R[:, 2, 1] - R[:, 1, 2],
                      R[:, 0, 2] - R[:, 2, 0],
                      R[:, 1, 0] - R[:, 0, 1]], axis=1) / (2.0 * sin[:, None] + 1e-8)
    return axis * angle[:, None]


def rodrigues(aa):
    """aa: (N, 3) axis-angle -> (N, 3, 3) rotation matrices."""
    n = aa.shape[0]
    angle = jnp.linalg.norm(aa, axis=1, keepdims=True) + 1e-8
    axis = aa / angle
    c = jnp.cos(angle)[..., None]
    s = jnp.sin(angle)[..., None]
    rx, ry, rz = axis[:, 0], axis[:, 1], axis[:, 2]
    zeros = jnp.zeros(n, jnp.float32)
    K = jnp.stack([zeros, -rz, ry, rz, zeros, -rx, -ry, rx, zeros],
                  axis=1).reshape(n, 3, 3)
    eye = jnp.eye(3, dtype=jnp.float32)[None]
    return eye + s * K + (1.0 - c) * jnp.matmul(K, K)


def mano_layer_forward(params, global_orient, hand_pose, betas):
    """Synthetic MANO LBS: returns vertices (B, V, 3)."""
    B = betas.shape[0]
    full_pose = jnp.concatenate([global_orient, hand_pose], axis=1)       # (B, 48)
    rot = rodrigues(full_pose.reshape(-1, 3)).reshape(B, MANO_ORIG_JOINT_NUM, 3, 3)
    pose_feature = (rot[:, 1:] - jnp.eye(3, dtype=jnp.float32)[None, None]
                    ).reshape(B, (MANO_ORIG_JOINT_NUM - 1) * 9)

    # fused blend shapes + rest-pose joint regression (Pallas, one matmul)
    v_posed_flat, j_flat = pallas_mano_blend(params, betas, pose_feature)
    v_posed = v_posed_flat.reshape(B, MANO_V, 3)
    J = j_flat.reshape(B, MANO_ORIG_JOINT_NUM, 3)

    # kinematic chain + LBS (small 4x4 algebra, plain JAX)
    # TODO(synk): LBS skinning could be folded into the regress/project kernel
    #             to avoid the mesh HBM round-trip (review "longer term" item).
    parents = jnp.array(MANO_PARENTS[1:], jnp.int32)
    rel_j = jnp.concatenate([J[:, :1], J[:, 1:] - J[:, parents]], axis=1)
    bottom = jnp.tile(jnp.array([0.0, 0.0, 0.0, 1.0], jnp.float32)[None, None, None, :],
                      (B, MANO_ORIG_JOINT_NUM, 1, 1))
    T_local = jnp.concatenate(
        [jnp.concatenate([rot, rel_j[..., None]], axis=-1), bottom], axis=-2)

    A = [T_local[:, 0]]
    for i in range(1, MANO_ORIG_JOINT_NUM):
        A.append(jnp.matmul(A[MANO_PARENTS[i]], T_local[:, i]))
    A = jnp.stack(A, axis=1)                                              # (B,16,4,4)

    joints_h = jnp.concatenate(
        [J, jnp.zeros((B, MANO_ORIG_JOINT_NUM, 1), jnp.float32)], axis=-1)[..., None]
    corr = jnp.matmul(A, joints_h)
    A_rel = A - jnp.concatenate(
        [jnp.zeros((B, MANO_ORIG_JOINT_NUM, 4, 3), jnp.float32), corr], axis=-1)

    T = jnp.einsum('vj,bjpq->bvpq', params['lbs_weights'], A_rel)         # (B,V,4,4)
    v_h = jnp.concatenate([v_posed, jnp.ones((B, MANO_V, 1), jnp.float32)], axis=-1)
    verts = jnp.einsum('bvpq,bvq->bvp', T, v_h)[..., :3]
    return verts


# ------------------------------ parameters -----------------------------------
def init_params(key):
    ks = jax.random.split(key, 9)

    def w(k, shape, scale=0.05):
        return scale * jax.random.normal(k, shape, dtype=jnp.float32)

    pool_area = POOL_H * POOL_W
    # backbone 1x1 conv fused with the 8x8 average pool: (PATCH, FEAT) weight
    bb_w = w(ks[0], (3, FEAT_DIM))
    bb_pool_w = jnp.repeat(bb_w, pool_area, axis=0) / pool_area           # (192, 64)
    bb_b = jnp.zeros((1, FEAT_DIM), jnp.float32)

    # position-net 1x1 conv, channels (j, d); joints padded 21->24, stacked (64, 192)
    pn_raw = w(ks[1], (JOINT_NUM, HM_D, FEAT_DIM))                        # [j, d, c]
    pn_w = jnp.pad(pn_raw, ((0, JOINT_PAD - JOINT_NUM), (0, 0), (0, 0)))
    pn_w = pn_w.reshape(JOINT_PAD * HM_D, FEAT_DIM).T                     # (64, 192)
    pn_b = jnp.zeros((1, JOINT_PAD * HM_D), jnp.float32)

    # rotation-net FC, augmented with an identity block that passes x/y/z out
    # lane-dense; padded joint input rows keep ZERO rn weights (padding invariant).
    rn_raw = w(ks[2], (RN_OUT, FEAT_DIM + 3 * JOINT_NUM))                 # (109, 127)
    w_aug = jnp.zeros((RN_IN_PAD, AUG_OUT), jnp.float32)
    w_aug = w_aug.at[:FEAT_DIM, :RN_OUT].set(rn_raw[:, :FEAT_DIM].T)
    eye_j = jnp.eye(JOINT_PAD, dtype=jnp.float32)
    for c in range(3):
        src = rn_raw[:, FEAT_DIM + c * JOINT_NUM: FEAT_DIM + (c + 1) * JOINT_NUM]
        r0 = FEAT_DIM + c * JOINT_PAD
        w_aug = w_aug.at[r0:r0 + JOINT_NUM, :RN_OUT].set(src.T)
        c0 = RN_OUT_PAD + c * JOINT_PAD
        w_aug = w_aug.at[r0:r0 + JOINT_PAD, c0:c0 + JOINT_PAD].set(eye_j)
    b_aug = jnp.zeros((1, AUG_OUT), jnp.float32)

    # constant depth-reduction matrix for the soft-argmax ({1, d} weights per joint)
    r = jnp.arange(JOINT_PAD * HM_D)
    jj = r // HM_D
    dd = (r % HM_D).astype(jnp.float32)
    wd = jnp.zeros((JOINT_PAD * HM_D, 2 * JOINT_PAD), jnp.float32)
    wd = wd.at[r, jj].set(1.0)
    wd = wd.at[r, JOINT_PAD + jj].set(dd)

    # synthetic MANO assets
    v_template = 0.1 * jax.random.normal(ks[3], (MANO_V, 3), jnp.float32)
    shapedirs = 0.01 * jax.random.normal(ks[4], (10, MANO_V * 3), jnp.float32)
    posedirs = 0.01 * jax.random.normal(
        ks[5], ((MANO_ORIG_JOINT_NUM - 1) * 9, MANO_V * 3), jnp.float32)
    j_reg_int = jax.nn.softmax(
        jax.random.normal(ks[6], (MANO_ORIG_JOINT_NUM, MANO_V)), axis=1).astype(jnp.float32)
    lbs_weights = jax.nn.softmax(
        2.0 * jax.random.normal(ks[7], (MANO_V, MANO_ORIG_JOINT_NUM)), axis=1
    ).astype(jnp.float32)
    joint_regressor = jax.nn.softmax(
        jax.random.normal(ks[8], (JOINT_NUM, MANO_V)), axis=1).astype(jnp.float32)

    eye3 = jnp.eye(3, dtype=jnp.float32)
    v_template_flat = v_template.reshape(1, MANO_V * 3)
    jreg_int_kron = jnp.kron(j_reg_int, eye3).T                           # (192, 48)

    # fused blend weight: [betas | pose_feature] (B,145) @ blend_w (145,240) + blend_b
    blend_w = jnp.zeros((BLEND_IN, BLEND_OUT), jnp.float32)
    blend_w = blend_w.at[:10, :MANO_V * 3].set(shapedirs)
    blend_w = blend_w.at[10:, :MANO_V * 3].set(posedirs)
    blend_w = blend_w.at[:10, MANO_V * 3:].set(shapedirs @ jreg_int_kron)
    blend_b = jnp.concatenate(
        [v_template_flat, v_template_flat @ jreg_int_kron], axis=1)       # (1, 240)

    # mesh -> joint regressor, coordinate-major output columns [x(21)|y(21)|z(21)]
    wj = jnp.kron(joint_regressor, eye3).T                                # (192, 63)
    joint_reg_kron_cm = (wj.reshape(MANO_V * 3, JOINT_NUM, 3)
                         .transpose(0, 2, 1).reshape(MANO_V * 3, 3 * JOINT_NUM))

    return dict(
        bb_pool_w=bb_pool_w, bb_b=bb_b, pn_w=pn_w, pn_b=pn_b, wd=wd,
        rn_aug_w=w_aug, rn_aug_b=b_aug,
        blend_w=blend_w, blend_b=blend_b,
        joint_reg_kron_cm=joint_reg_kron_cm,
        lbs_weights=lbs_weights,
    )


# ------------------------------ model forward --------------------------------
def model_forward(params, img, mode='test'):
    """img: NCHW (B, 3, H, W) float32, mirrors Model.forward() for cfg.parts='hand'."""
    if mode == 'train':
        # TODO(synk): CoordLoss / ParamLoss training branch not implemented.
        raise NotImplementedError("train mode not implemented")
    B = img.shape[0]

    # fused backbone -> position-net -> soft-argmax -> rotation-net (ONE pallas_call)
    joint_img, rn_out = pallas_vision_head(params, img)     # (B,21,3), (B,109)

    n6 = (MANO_ORIG_JOINT_NUM - 1) * 6
    root6d = rn_out[:, :6]
    pose6d = rn_out[:, 6:6 + n6]
    mano_shape = rn_out[:, 6 + n6:6 + n6 + 10]
    cam_param = rn_out[:, 6 + n6 + 10:RN_OUT]

    mano_root_pose = rot6d_to_axis_angle(root6d).reshape(-1, 3)
    mano_hand_pose = rot6d_to_axis_angle(pose6d.reshape(-1, 6)).reshape(
        -1, (MANO_ORIG_JOINT_NUM - 1) * 3)
    cam_trans = get_camera_trans(cam_param)

    # MANO layer (fused blend-shape kernel + plain-JAX kinematic chain / LBS)
    mesh_cam = mano_layer_forward(params, mano_root_pose, mano_hand_pose, mano_shape)

    # fused joint regression + projection + root-centering + mesh translation
    jproj_cm, jcam_cm, mesh_out_flat = pallas_regress_project(
        params, mesh_cam.reshape(B, MANO_V * 3), cam_trans)
    joint_proj = jproj_cm.reshape(B, 2, JOINT_NUM).transpose(0, 2, 1)
    joint_cam = jcam_cm.reshape(B, 3, JOINT_NUM).transpose(0, 2, 1)
    mesh_cam_out = mesh_out_flat.reshape(B, MANO_V, 3)

    mano_pose = jnp.concatenate([mano_root_pose, mano_hand_pose], axis=1)

    return {
        'cam_trans': cam_trans,
        'img': img,
        'joint_img': joint_img,
        'joint_cam': joint_cam,
        'joint_proj': joint_proj,
        'mano_mesh_cam': mesh_cam_out,
        'mano_pose': mano_pose,
        'mano_shape': mano_shape,
    }


# ---------------------------------- main --------------------------------------
if __name__ == "__main__":
    key = jax.random.PRNGKey(0)
    kp, ki = jax.random.split(key)
    params = init_params(kp)
    img = jax.random.normal(
        ki, (2, 3, CFG['input_img_shape'][0], CFG['input_img_shape'][1]), jnp.float32)

    fwd = jax.jit(functools.partial(model_forward, mode='test'))
    out = fwd(params, img)
    jax.block_until_ready(out)

    # light sanity checks on shapes
    assert out['joint_img'].shape == (2, JOINT_NUM, 3)
    assert out['joint_proj'].shape == (2, JOINT_NUM, 2)
    assert out['joint_cam'].shape == (2, JOINT_NUM, 3)
    assert out['mano_mesh_cam'].shape == (2, MANO_V, 3)
    assert out['mano_pose'].shape == (2, MANO_ORIG_JOINT_NUM * 3)
    assert out['mano_shape'].shape == (2, 10)
    assert out['cam_trans'].shape == (2, 3)
    print("KERNEL_OK")
</pallas_src>

<mosaic_0001>
module attributes {stable_mosaic.version = 11 : i64} {
  func.func @_vision_head_kernel(%arg0: i32, %arg1: memref<128x192xf32, #tpu.memory_space<vmem>>, %arg2: memref<192x64xf32, #tpu.memory_space<vmem>>, %arg3: memref<1x64xf32, #tpu.memory_space<vmem>>, %arg4: memref<64x192xf32, #tpu.memory_space<vmem>>, %arg5: memref<1x192xf32, #tpu.memory_space<vmem>>, %arg6: memref<6x128xf32, #tpu.memory_space<vmem>>, %arg7: memref<2x128xf32, #tpu.memory_space<vmem>>, %arg8: memref<192x48xf32, #tpu.memory_space<vmem>>, %arg9: memref<136x256xf32, #tpu.memory_space<vmem>>, %arg10: memref<1x256xf32, #tpu.memory_space<vmem>>, %arg11: memref<2x256xf32, #tpu.memory_space<vmem>>) attributes {dimension_semantics = [#tpu.dimension_semantics<parallel>], iteration_bounds = array<i64: 1>, scalar_prefetch = 0 : i64, scratch_operands = 0 : i64, tpu.core_type = #tpu.core_type<tc>, window_params = [{transform_indices = @transform_0, window_bounds = array<i64: 128, 192>}, {pipeline_mode = #tpu.pipeline_mode<synchronous>, transform_indices = @transform_1, window_bounds = array<i64: 192, 64>}, {pipeline_mode = #tpu.pipeline_mode<synchronous>, transform_indices = @transform_2, window_bounds = array<i64: 1, 64>}, {pipeline_mode = #tpu.pipeline_mode<synchronous>, transform_indices = @transform_3, window_bounds = array<i64: 64, 192>}, {pipeline_mode = #tpu.pipeline_mode<synchronous>, transform_indices = @transform_4, window_bounds = array<i64: 1, 192>}, {pipeline_mode = #tpu.pipeline_mode<synchronous>, transform_indices = @transform_5, window_bounds = array<i64: 6, 128>}, {pipeline_mode = #tpu.pipeline_mode<synchronous>, transform_indices = @transform_6, window_bounds = array<i64: 2, 128>}, {pipeline_mode = #tpu.pipeline_mode<synchronous>, transform_indices = @transform_7, window_bounds = array<i64: 192, 48>}, {pipeline_mode = #tpu.pipeline_mode<synchronous>, transform_indices = @transform_8, window_bounds = array<i64: 136, 256>}, {pipeline_mode = #tpu.pipeline_mode<synchronous>, transform_indices = @transform_9, window_bounds = array<i64: 1, 256>}, {transform_indices = @transform_10, window_bounds = array<i64: 2, 256>}]} {
    %c0 = arith.constant 0 : index
    %c0_0 = arith.constant 0 : index
    %0 = vector.load %arg1[%c0, %c0_0] : memref<128x192xf32, #tpu.memory_space<vmem>>, vector<128x192xf32>
    %c0_1 = arith.constant 0 : index
    %c0_2 = arith.constant 0 : index
    %1 = vector.load %arg2[%c0_1, %c0_2] : memref<192x64xf32, #tpu.memory_space<vmem>>, vector<192x64xf32>
    %cst = arith.constant dense<0.000000e+00> : vector<128x64xf32>
    %2 = tpu.matmul %0, %1, %cst {dimension_numbers = #tpu.dot_dimension_numbers<[1], [0], [0], [1], [0, 0, 1, 1], [], []>} : vector<128x192xf32>, vector<192x64xf32>, vector<128x64xf32> -> vector<128x64xf32>
    %c0_3 = arith.constant 0 : index
    %c0_4 = arith.constant 0 : index
    %3 = vector.load %arg3[%c0_3, %c0_4] : memref<1x64xf32, #tpu.memory_space<vmem>>, vector<1x64xf32>
    %4 = vector.broadcast %3 : vector<1x64xf32> to vector<128x64xf32>
    %5 = arith.addf %2, %4 : vector<128x64xf32>
    %cst_5 = arith.constant 0.000000e+00 : f32
    %6 = vector.broadcast %cst_5 : f32 to vector<128x64xf32>
    %7 = arith.maximumf %5, %6 : vector<128x64xf32>
    %c0_6 = arith.constant 0 : index
    %c0_7 = arith.constant 0 : index
    %8 = vector.load %arg4[%c0_6, %c0_7] : memref<64x192xf32, #tpu.memory_space<vmem>>, vector<64x192xf32>
    %cst_8 = arith.constant dense<0.000000e+00> : vector<128x192xf32>
    %9 = tpu.matmul %7, %8, %cst_8 {dimension_numbers = #tpu.dot_dimension_numbers<[1], [0], [0], [1], [0, 0, 1, 1], [], []>} : vector<128x64xf32>, vector<64x192xf32>, vector<128x192xf32> -> vector<128x192xf32>
    %c0_9 = arith.constant 0 : index
    %c0_10 = arith.constant 0 : index
    %10 = vector.load %arg5[%c0_9, %c0_10] : memref<1x192xf32, #tpu.memory_space<vmem>>, vector<1x192xf32>
    %11 = vector.broadcast %10 : vector<1x192xf32> to vector<128x192xf32>
    %12 = arith.addf %9, %11 : vector<128x192xf32>
    %cst_11 = arith.constant dense<0xFF800000> : vector<128xf32>
    %13 = vector.multi_reduction <maximumf>, %12, %cst_11 [1] : vector<128x192xf32> to vector<128xf32>
    %14 = vector.shape_cast %13 : vector<128xf32> to vector<128x1xf32>
    %cst_12 = arith.constant dense<0xFF800000> : vector<1xf32>
    %15 = vector.multi_reduction <maximumf>, %14, %cst_12 [0] : vector<128x1xf32> to vector<1xf32>
    %16 = vector.shape_cast %15 : vector<1xf32> to vector<1x1xf32>
    %17 = vector.broadcast %16 : vector<1x1xf32> to vector<128x192xf32>
    %18 = arith.subf %12, %17 : vector<128x192xf32>
    %19 = math.exp %18 : vector<128x192xf32>
    %c0_13 = arith.constant 0 : index
    %c0_14 = arith.constant 0 : index
    %20 = vector.load %arg6[%c0_13, %c0_14] : memref<6x128xf32, #tpu.memory_space<vmem>>, vector<6x128xf32>
    %cst_15 = arith.constant dense<0.000000e+00> : vector<6x192xf32>
    %21 = tpu.matmul %20, %19, %cst_15 {dimension_numbers = #tpu.dot_dimension_numbers<[1], [0], [0], [1], [0, 0, 1, 1], [], []>} : vector<6x128xf32>, vector<128x192xf32>, vector<6x192xf32> -> vector<6x192xf32>
    %c0_16 = arith.constant 0 : index
    %c0_17 = arith.constant 0 : index
    %22 = vector.load %arg8[%c0_16, %c0_17] : memref<192x48xf32, #tpu.memory_space<vmem>>, vector<192x48xf32>
    %cst_18 = arith.constant dense<0.000000e+00> : vector<6x48xf32>
    %23 = tpu.matmul %21, %22, %cst_18 {dimension_numbers = #tpu.dot_dimension_numbers<[1], [0], [0], [1], [0, 0, 1, 1], [], []>} : vector<6x192xf32>, vector<192x48xf32>, vector<6x48xf32> -> vector<6x48xf32>
    %c0_19 = arith.constant 0 : index
    %c0_20 = arith.constant 0 : index
    %24 = vector.load %arg7[%c0_19, %c0_20] : memref<2x128xf32, #tpu.memory_space<vmem>>, vector<2x128xf32>
    %cst_21 = arith.constant dense<0.000000e+00> : vector<2x64xf32>
    %25 = tpu.matmul %24, %7, %cst_21 {dimension_numbers = #tpu.dot_dimension_numbers<[1], [0], [0], [1], [0, 0, 1, 1], [], []>} : vector<2x128xf32>, vector<128x64xf32>, vector<2x64xf32> -> vector<2x64xf32>
    %26 = vector.extract_strided_slice %23 {offsets = [0, 0], sizes = [1, 24], strides = [1, 1]} : vector<6x48xf32> to vector<1x24xf32>
    %27 = tpu.reciprocal %26 : vector<1x24xf32> -> vector<1x24xf32>
    %28 = vector.extract_strided_slice %23 {offsets = [1, 0], sizes = [1, 24], strides = [1, 1]} : vector<6x48xf32> to vector<1x24xf32>
    %29 = arith.mulf %28, %27 : vector<1x24xf32>
    %30 = vector.extract_strided_slice %23 {offsets = [2, 0], sizes = [1, 24], strides = [1, 1]} : vector<6x48xf32> to vector<1x24xf32>
    %31 = arith.mulf %30, %27 : vector<1x24xf32>
    %32 = vector.extract_strided_slice %23 {offsets = [0, 24], sizes = [1, 24], strides = [1, 1]} : vector<6x48xf32> to vector<1x24xf32>
    %33 = arith.mulf %32, %27 : vector<1x24xf32>
    %34 = vector.extract_strided_slice %25 {offsets = [0, 0], sizes = [1, 64], strides = [1, 1]} : vector<2x64xf32> to vector<1x64xf32>
    %35 = tpu.concatenate %34, %29, %31, %33 in 1 : vector<1x64xf32>, vector<1x24xf32>, vector<1x24xf32>, vector<1x24xf32> -> vector<1x136xf32>
    %36 = vector.extract_strided_slice %23 {offsets = [3, 0], sizes = [1, 24], strides = [1, 1]} : vector<6x48xf32> to vector<1x24xf32>
    %37 = tpu.reciprocal %36 : vector<1x24xf32> -> vector<1x24xf32>
    %38 = vector.extract_strided_slice %23 {offsets = [4, 0], sizes = [1, 24], strides = [1, 1]} : vector<6x48xf32> to vector<1x24xf32>
    %39 = arith.mulf %38, %37 : vector<1x24xf32>
    %40 = vector.extract_strided_slice %23 {offsets = [5, 0], sizes = [1, 24], strides = [1, 1]} : vector<6x48xf32> to vector<1x24xf32>
    %41 = arith.mulf %40, %37 : vector<1x24xf32>
    %42 = vector.extract_strided_slice %23 {offsets = [3, 24], sizes = [1, 24], strides = [1, 1]} : vector<6x48xf32> to vector<1x24xf32>
    %43 = arith.mulf %42, %37 : vector<1x24xf32>
    %44 = vector.extract_strided_slice %25 {offsets = [1, 0], sizes = [1, 64], strides = [1, 1]} : vector<2x64xf32> to vector<1x64xf32>
    %45 = tpu.concatenate %44, %39, %41, %43 in 1 : vector<1x64xf32>, vector<1x24xf32>, vector<1x24xf32>, vector<1x24xf32> -> vector<1x136xf32>
    %46 = tpu.concatenate %35, %45 in 0 : vector<1x136xf32>, vector<1x136xf32> -> vector<2x136xf32>
    %c0_22 = arith.constant 0 : index
    %c0_23 = arith.constant 0 : index
    %47 = vector.load %arg9[%c0_22, %c0_23] : memref<136x256xf32, #tpu.memory_space<vmem>>, vector<136x256xf32>
    %cst_24 = arith.constant dense<0.000000e+00> : vector<2x256xf32>
    %48 = tpu.matmul %46, %47, %cst_24 {dimension_numbers = #tpu.dot_dimension_numbers<[1], [0], [0], [1], [0, 0, 1, 1], [], []>} : vector<2x136xf32>, vector<136x256xf32>, vector<2x256xf32> -> vector<2x256xf32>
    %c0_25 = arith.constant 0 : index
    %c0_26 = arith.constant 0 : index
    %49 = vector.load %arg10[%c0_25, %c0_26] : memref<1x256xf32, #tpu.memory_space<vmem>>, vector<1x256xf32>
    %50 = vector.broadcast %49 : vector<1x256xf32> to vector<2x256xf32>
    %51 = arith.addf %48, %50 : vector<2x256xf32>
    %c0_27 = arith.constant 0 : index
    %c0_28 = arith.constant 0 : index
    %52 = vector.load %arg11[%c0_27, %c0_28] : memref<2x256xf32, #tpu.memory_space<vmem>>, vector<2x256xf32>
    tpu.vector_store %arg11[%c0_27, %c0_28], %51 {strides = array<i32>} : memref<2x256xf32, #tpu.memory_space<vmem>>, vector<2x256xf32>,
    return
  }
  func.func @transform_0(%arg0: i32) -> (i32, i32) {
    %c0_i32 = arith.constant 0 : i32
    %c0_i32_0 = arith.constant 0 : i32
    return %arg0, %c0_i32 : i32, i32
  }
  func.func @transform_1(%arg0: i32) -> (i32, i32) {
    %c0_i32 = arith.constant 0 : i32
    %c0_i32_0 = arith.constant 0 : i32
    %c0_i32_1 = arith.constant 0 : i32
    return %c0_i32, %c0_i32_0 : i32, i32
  }
  func.func @transform_2(%arg0: i32) -> (i32, i32) {
    %c0_i32 = arith.constant 0 : i32
    %c0_i32_0 = arith.constant 0 : i32
    %c0_i32_1 = arith.constant 0 : i32
    return %c0_i32, %c0_i32_0 : i32, i32
  }
  func.func @transform_3(%arg0: i32) -> (i32, i32) {
    %c0_i32 = arith.constant 0 : i32
    %c0_i32_0 = arith.constant 0 : i32
    %c0_i32_1 = arith.constant 0 : i32
    return %c0_i32, %c0_i32_0 : i32, i32
  }
  func.func @transform_4(%arg0: i32) -> (i32, i32) {
    %c0_i32 = arith.constant 0 : i32
    %c0_i32_0 = arith.constant 0 : i32
    %c0_i32_1 = arith.constant 0 : i32
    return %c0_i32, %c0_i32_0 : i32, i32
  }
  func.func @transform_5(%arg0: i32) -> (i32, i32) {
    %c0_i32 = arith.constant 0 : i32
    %c0_i32_0 = arith.constant 0 : i32
    %c0_i32_1 = arith.constant 0 : i32
    return %c0_i32, %c0_i32_0 : i32, i32
  }
  func.func @transform_6(%arg0: i32) -> (i32, i32) {
    %c0_i32 = arith.constant 0 : i32
    %c0_i32_0 = arith.constant 0 : i32
    %c0_i32_1 = arith.constant 0 : i32
    return %c0_i32, %c0_i32_0 : i32, i32
  }
  func.func @transform_7(%arg0: i32) -> (i32, i32) {
    %c0_i32 = arith.constant 0 : i32
    %c0_i32_0 = arith.constant 0 : i32
    %c0_i32_1 = arith.constant 0 : i32
    return %c0_i32, %c0_i32_0 : i32, i32
  }
  func.func @transform_8(%arg0: i32) -> (i32, i32) {
    %c0_i32 = arith.constant 0 : i32
    %c0_i32_0 = arith.constant 0 : i32
    %c0_i32_1 = arith.constant 0 : i32
    return %c0_i32, %c0_i32_0 : i32, i32
  }
  func.func @transform_9(%arg0: i32) -> (i32, i32) {
    %c0_i32 = arith.constant 0 : i32
    %c0_i32_0 = arith.constant 0 : i32
    %c0_i32_1 = arith.constant 0 : i32
    return %c0_i32, %c0_i32_0 : i32, i32
  }
  func.func @transform_10(%arg0: i32) -> (i32, i32) {
    %c0_i32 = arith.constant 0 : i32
    %c0_i32_0 = arith.constant 0 : i32
    return %arg0, %c0_i32 : i32, i32
  }
}

module attributes {stable_mosaic.version = 11 : i64} {
  func.func @_mano_blend_kernel(%arg0: memref<2x145xf32, #tpu.memory_space<vmem>>, %arg1: memref<145x240xf32, #tpu.memory_space<vmem>>, %arg2: memref<1x240xf32, #tpu.memory_space<vmem>>, %arg3: memref<2x240xf32, #tpu.memory_space<vmem>>) attributes {dimension_semantics = [], scalar_prefetch = 0 : i64, scratch_operands = 0 : i64, tpu.core_type = #tpu.core_type<tc>} {
    %c0 = arith.constant 0 : index
    %c0_0 = arith.constant 0 : index
    %0 = vector.load %arg0[%c0, %c0_0] : memref<2x145xf32, #tpu.memory_space<vmem>>, vector<2x145xf32>
    %c0_1 = arith.constant 0 : index
    %c0_2 = arith.constant 0 : index
    %1 = vector.load %arg1[%c0_1, %c0_2] : memref<145x240xf32, #tpu.memory_space<vmem>>, vector<145x240xf32>
    %cst = arith.constant dense<0.000000e+00> : vector<2x240xf32>
    %2 = tpu.matmul %0, %1, %cst {dimension_numbers = #tpu.dot_dimension_numbers<[1], [0], [0], [1], [0, 0, 1, 1], [], []>} : vector<2x145xf32>, vector<145x240xf32>, vector<2x240xf32> -> vector<2x240xf32>
    %c0_3 = arith.constant 0 : index
    %c0_4 = arith.constant 0 : index
    %3 = vector.load %arg2[%c0_3, %c0_4] : memref<1x240xf32, #tpu.memory_space<vmem>>, vector<1x240xf32>
    %4 = vector.broadcast %3 : vector<1x240xf32> to vector<2x240xf32>
    %5 = arith.addf %2, %4 : vector<2x240xf32>
    %c0_5 = arith.constant 0 : index
    %c0_6 = arith.constant 0 : index
    %6 = vector.load %arg3[%c0_5, %c0_6] : memref<2x240xf32, #tpu.memory_space<vmem>>, vector<2x240xf32>
    tpu.vector_store %arg3[%c0_5, %c0_6], %5 {strides = array<i32>} : memref<2x240xf32, #tpu.memory_space<vmem>>, vector<2x240xf32>,
    return
  }
}

module attributes {stable_mosaic.version = 11 : i64} {
  func.func @_regress_project_kernel(%arg0: memref<2x192xf32, #tpu.memory_space<vmem>>, %arg1: memref<2x3xf32, #tpu.memory_space<vmem>>, %arg2: memref<192x63xf32, #tpu.memory_space<vmem>>, %arg3: memref<2x42xf32, #tpu.memory_space<vmem>>, %arg4: memref<2x63xf32, #tpu.memory_space<vmem>>, %arg5: memref<2x192xf32, #tpu.memory_space<vmem>>) attributes {dimension_semantics = [], scalar_prefetch = 0 : i64, scratch_operands = 0 : i64, tpu.core_type = #tpu.core_type<tc>} {
    %c0 = arith.constant 0 : index
    %c0_0 = arith.constant 0 : index
    %0 = vector.load %arg0[%c0, %c0_0] : memref<2x192xf32, #tpu.memory_space<vmem>>, vector<2x192xf32>
    %c0_1 = arith.constant 0 : index
    %c0_2 = arith.constant 0 : index
    %1 = vector.load %arg2[%c0_1, %c0_2] : memref<192x63xf32, #tpu.memory_space<vmem>>, vector<192x63xf32>
    %cst = arith.constant dense<0.000000e+00> : vector<2x63xf32>
    %2 = tpu.matmul %0, %1, %cst {dimension_numbers = #tpu.dot_dimension_numbers<[1], [0], [0], [1], [0, 0, 1, 1], [], []>} : vector<2x192xf32>, vector<192x63xf32>, vector<2x63xf32> -> vector<2x63xf32>
    %3 = vector.extract_strided_slice %2 {offsets = [0, 0], sizes = [2, 21], strides = [1, 1]} : vector<2x63xf32> to vector<2x21xf32>
    %4 = vector.extract_strided_slice %2 {offsets = [0, 21], sizes = [2, 21], strides = [1, 1]} : vector<2x63xf32> to vector<2x21xf32>
    %5 = vector.extract_strided_slice %2 {offsets = [0, 42], sizes = [2, 21], strides = [1, 1]} : vector<2x63xf32> to vector<2x21xf32>
    %c0_3 = arith.constant 0 : index
    %c0_4 = arith.constant 0 : index
    %6 = vector.load %arg1[%c0_3, %c0_4] : memref<2x3xf32, #tpu.memory_space<vmem>>, vector<2x3xf32>
    %7 = vector.extract_strided_slice %6 {offsets = [0, 0], sizes = [2, 1], strides = [1, 1]} : vector<2x3xf32> to vector<2x1xf32>
    %8 = vector.extract_strided_slice %6 {offsets = [0, 1], sizes = [2, 1], strides = [1, 1]} : vector<2x3xf32> to vector<2x1xf32>
    %9 = vector.extract_strided_slice %6 {offsets = [0, 2], sizes = [2, 1], strides = [1, 1]} : vector<2x3xf32> to vector<2x1xf32>
    %10 = vector.broadcast %9 : vector<2x1xf32> to vector<2x21xf32>
    %11 = arith.addf %5, %10 : vector<2x21xf32>
    %cst_5 = arith.constant 9.99999974E-5 : f32
    %12 = vector.broadcast %cst_5 : f32 to vector<2x21xf32>
    %13 = arith.addf %11, %12 : vector<2x21xf32>
    %14 = tpu.reciprocal %13 : vector<2x21xf32> -> vector<2x21xf32>
    %15 = vector.broadcast %7 : vector<2x1xf32> to vector<2x21xf32>
    %16 = arith.addf %3, %15 : vector<2x21xf32>
    %17 = arith.mulf %16, %14 : vector<2x21xf32>
    %cst_6 = arith.constant 6.250000e+02 : f32
    %18 = vector.broadcast %cst_6 : f32 to vector<2x21xf32>
    %19 = arith.mulf %17, %18 : vector<2x21xf32>
    %cst_7 = arith.constant 4.000000e+00 : f32
    %20 = vector.broadcast %cst_7 : f32 to vector<2x21xf32>
    %21 = arith.addf %19, %20 : vector<2x21xf32>
    %22 = vector.broadcast %8 : vector<2x1xf32> to vector<2x21xf32>
    %23 = arith.addf %4, %22 : vector<2x21xf32>
    %24 = arith.mulf %23, %14 : vector<2x21xf32>
    %cst_8 = arith.constant 6.250000e+02 : f32
    %25 = vector.broadcast %cst_8 : f32 to vector<2x21xf32>
    %26 = arith.mulf %24, %25 : vector<2x21xf32>
    %cst_9 = arith.constant 4.000000e+00 : f32
    %27 = vector.broadcast %cst_9 : f32 to vector<2x21xf32>
    %28 = arith.addf %26, %27 : vector<2x21xf32>
    %29 = tpu.concatenate %21, %28 in 1 : vector<2x21xf32>, vector<2x21xf32> -> vector<2x42xf32>
    %c0_10 = arith.constant 0 : index
    %c0_11 = arith.constant 0 : index
    %30 = vector.load %arg3[%c0_10, %c0_11] : memref<2x42xf32, #tpu.memory_space<vmem>>, vector<2x42xf32>
    tpu.vector_store %arg3[%c0_10, %c0_11], %29 {strides = array<i32>} : memref<2x42xf32, #tpu.memory_space<vmem>>, vector<2x42xf32>,
    %31 = vector.extract_strided_slice %3 {offsets = [0, 0], sizes = [2, 1], strides = [1, 1]} : vector<2x21xf32> to vector<2x1xf32>
    %32 = vector.extract_strided_slice %4 {offsets = [0, 0], sizes = [2, 1], strides = [1, 1]} : vector<2x21xf32> to vector<2x1xf32>
    %33 = vector.extract_strided_slice %5 {offsets = [0, 0], sizes = [2, 1], strides = [1, 1]} : vector<2x21xf32> to vector<2x1xf32>
    %34 = vector.broadcast %31 : vector<2x1xf32> to vector<2x21xf32>
    %35 = arith.subf %3, %34 : vector<2x21xf32>
    %36 = vector.broadcast %32 : vector<2x1xf32> to vector<2x21xf32>
    %37 = arith.subf %4, %36 : vector<2x21xf32>
    %38 = vector.broadcast %33 : vector<2x1xf32> to vector<2x21xf32>
    %39 = arith.subf %5, %38 : vector<2x21xf32>
    %40 = tpu.concatenate %35, %37, %39 in 1 : vector<2x21xf32>, vector<2x21xf32>, vector<2x21xf32> -> vector<2x63xf32>
    %c0_12 = arith.constant 0 : index
    %c0_13 = arith.constant 0 : index
    %41 = vector.load %arg4[%c0_12, %c0_13] : memref<2x63xf32, #tpu.memory_space<vmem>>, vector<2x63xf32>
    tpu.vector_store %arg4[%c0_12, %c0_13], %40 {strides = array<i32>} : memref<2x63xf32, #tpu.memory_space<vmem>>, vector<2x63xf32>,
    %42 = tpu.iota {dimensions = array<i32: 1>} : vector<2x192xi32>
    %c3_i32 = arith.constant 3 : i32
    %c0_i32 = arith.constant 0 : i32
    %43 = arith.cmpi eq, %c3_i32, %c0_i32 : i32
    %c1_i32 = arith.constant 1 : i32
    %44 = arith.select %43, %c1_i32, %c3_i32 : i32
    %45 = vector.broadcast %44 : i32 to vector<2x192xi32>
    %46 = arith.remsi %42, %45 : vector<2x192xi32>
    %c0_i32_14 = arith.constant 0 : i32
    %47 = vector.broadcast %c0_i32_14 : i32 to vector<2x192xi32>
    %48 = arith.cmpi ne, %46, %47 : vector<2x192xi32>
    %c0_i32_15 = arith.constant 0 : i32
    %49 = vector.broadcast %c0_i32_15 : i32 to vector<2x192xi32>
    %50 = arith.cmpi slt, %46, %49 : vector<2x192xi32>
    %c0_i32_16 = arith.constant 0 : i32
    %51 = arith.cmpi slt, %44, %c0_i32_16 : i32
    %52 = vector.broadcast %51 : i1 to vector<2x192xi1>
    %53 = vector.broadcast %52 : vector<2x192xi1> to vector<2x192xi1>
    %54 = arith.xori %50, %53 : vector<2x192xi1>
    %55 = arith.andi %54, %48 : vector<2x192xi1>
    %56 = vector.broadcast %44 : i32 to vector<2x192xi32>
    %57 = arith.addi %46, %56 : vector<2x192xi32>
    %58 = arith.select %55, %57, %46 : vector<2x192xi1>, vector<2x192xi32>
    %c0_i32_17 = arith.constant 0 : i32
    %59 = vector.broadcast %c0_i32_17 : i32 to vector<2x192xi32>
    %60 = arith.cmpi eq, %58, %59 : vector<2x192xi32>
    %c1_i32_18 = arith.constant 1 : i32
    %61 = vector.broadcast %c1_i32_18 : i32 to vector<2x192xi32>
    %62 = arith.cmpi eq, %58, %61 : vector<2x192xi32>
    %63 = vector.shape_cast %8 : vector<2x1xf32> to vector<2x1xf32>
    %64 = vector.broadcast %63 : vector<2x1xf32> to vector<2x192xf32>
    %65 = vector.shape_cast %9 : vector<2x1xf32> to vector<2x1xf32>
    %66 = vector.broadcast %65 : vector<2x1xf32> to vector<2x192xf32>
    %67 = arith.select %62, %64, %66 : vector<2x192xi1>, vector<2x192xf32>
    %68 = vector.shape_cast %7 : vector<2x1xf32> to vector<2x1xf32>
    %69 = vector.broadcast %68 : vector<2x1xf32> to vector<2x192xf32>
    %70 = arith.select %60, %69, %67 : vector<2x192xi1>, vector<2x192xf32>
    %71 = arith.addf %0, %70 : vector<2x192xf32>
    %c0_19 = arith.constant 0 : index
    %c0_20 = arith.constant 0 : index
    %72 = vector.load %arg5[%c0_19, %c0_20] : memref<2x192xf32, #tpu.memory_space<vmem>>, vector<2x192xf32>
    tpu.vector_store %arg5[%c0_19, %c0_20], %71 {strides = array<i32>} : memref<2x192xf32, #tpu.memory_space<vmem>>, vector<2x192xf32>,
    return
  }
}

</mosaic_0001>

<bundles_post_ra>
// kernel: model_forward.3
= control target key start
LH: loop header
LB: loop body
LE: loop exit
PB: predicated region body
PF: predicated region fallthrough
CT: control target
= control target key end

     0   :  { %v1498_v0 = vmov 0.0|0.0   ;;  %vm98_vm0 = vcmask 523264   ;;  %vm1500_vm1 = vmmov 0   ;;  %s1502_s14 = smov 64   ;;  %s1503_s22 = smov 88   ;;  %vm993_vm2 = vcmask 719872   ;;  %s2333_s1 = inlined_call_operand.vmem [shape: f32[192,64], index: 1, kind: input, shape index: {}]   ;;  %s2334_s0 = inlined_call_operand.vmem [shape: f32[128,192], index: 0, kind: input, shape index: {}]   ;;  %s2335_s3 = inlined_call_operand.vmem [shape: f32[64,192], index: 3, kind: input, shape index: {}]   ;;  %s2336_s2 = inlined_call_operand.vmem [shape: f32[1,64], index: 2, kind: input, shape index: {}]   ;;  %s2337_s4 = inlined_call_operand.vmem [shape: f32[1,192], index: 4, kind: input, shape index: {}]   ;;  %s2338_s7 = inlined_call_operand.vmem [shape: f32[192,48], index: 7, kind: input, shape index: {}]   ;;  %s2339_s5 = inlined_call_operand.vmem [shape: f32[6,128], index: 5, kind: input, shape index: {}]   ;;  %s2340_s6 = inlined_call_operand.vmem [shape: f32[2,128], index: 6, kind: input, shape index: {}]   ;;  %s2341_s8 = inlined_call_operand.vmem [shape: f32[136,256], index: 8, kind: input, shape index: {}]   ;;  %s2342_s9 = inlined_call_operand.vmem [shape: f32[1,256], index: 9, kind: input, shape index: {}]   ;;  %s2343_s10 = inlined_call_operand.vmem [shape: f32[2,256], index: 10, kind: output, shape index: {}]  }
   0x1   :  { %1240 = vmatprep.subr.bf16.mxu0 %v1498_v0  ;;  %v67_v1 = vld [vmem:[%s2333_s1] sm:$0xff]  ;;  %v68_v2 = vld [vmem:[%s2333_s1 + $0x8] sm:$0xff]  ;;  %v69_v3 = vld [vmem:[%s2333_s1 + $0x10] sm:$0xff]  ;;  %vm995_vm3 = vcmask 916480   ;;  %vm1012_vm4 = vcmask 1040384   ;;  %vm1061_vm5 = vcmask 64512  }
   0x2   :  { %v1241_v4 = vpack.c.bf16 %v68_v2, %v67_v1  ;;  %v70_v5 = vld [vmem:[%s2333_s1 + $0x18] sm:$0xff]  ;;  %v71_v7 = vld [vmem:[%s2333_s1 + $0x20] sm:$0xff]  ;;  %v72_v8 = vld [vmem:[%s2333_s1 + $0x28] sm:$0xff] }
   0x3   :  { %v1244_v6 = vpack.c.bf16 %v70_v5, %v69_v3  ;;  %v1247_v9 = vpack.c.bf16 %v72_v8, %v71_v7  ;;  %v73_v10 = vld [vmem:[%s2333_s1 + $0x30] sm:$0xff]  ;;  %v74_v11 = vld [vmem:[%s2333_s1 + $0x38] sm:$0xff]  ;;  %v36_v12 = vld [vmem:[%s2334_s0 + $0x8] sm:$0xff] }
   0x4   :  { %1242 = vmatpush1.bf16.msra.mxu0 %v1241_v4  ;;  %1153 = vmatprep.mubr.msk.f32.mxu0 %vm98_vm0, %v36_v12  ;;  %v1250_v13 = vpack.c.bf16 %v74_v11, %v73_v10  ;;  %v75_v14 = vld [vmem:[%s2333_s1 + $0x40] sm:$0xff]  ;;  %v76_v15 = vld [vmem:[%s2333_s1 + $0x48] sm:$0xff]  ;;  %v77_v17 = vld [vmem:[%s2333_s1 + $0x50] sm:$0xff] }
   0x5   :  { %1243 = vmatprep.subr.bf16.mxu0 %v1498_v0  ;;  %v1253_v16 = vpack.c.bf16 %v76_v15, %v75_v14  ;;  %v78_v18 = vld [vmem:[%s2333_s1 + $0x58] sm:$0xff]  ;;  %v79_v19 = vld [vmem:[%s2333_s1 + $0x60] sm:$0xff]  ;;  %v80_v20 = vld [vmem:[%s2333_s1 + $0x68] sm:$0xff] }
   0x6   :  { %v309_v21 = vld [vmem:[%s2335_s3 + $0x8] sm:$0xff]  ;;  %v1256_v22 = vpack.c.bf16 %v78_v18, %v77_v17  ;;  %v311_v23 = vld [vmem:[%s2335_s3 + $0x18] sm:$0xff]  ;;  %v308_v24 = vld [vmem:[%s2335_s3] sm:$0xff]  ;;  %v1259_v35 = vpack.c.bf16 %v80_v20, %v79_v19 }
   0x7   :  { %v310_v25 = vld [vmem:[%s2335_s3 + $0x10] sm:$0xff]  ;;  %v1276_v26 = vpack.c.bf16 %v311_v23, %v309_v21  ;;  %v313_v28 = vld [vmem:[%s2335_s3 + $0x28] sm:$0xff]  ;;  %v315_v29 = vld [vmem:[%s2335_s3 + $0x38] sm:$0xff] }
   0x8   :  { %1245 = vmatpush1.bf16.msra.mxu0 %v1244_v6  ;;  %v1278_v27 = vpack.c.bf16 %v310_v25, %v308_v24  ;;  %v312_v30 = vld [vmem:[%s2335_s3 + $0x20] sm:$0xff]  ;;  %v1280_v31 = vpack.c.bf16 %v315_v29, %v313_v28  ;;  %v314_v32 = vld [vmem:[%s2335_s3 + $0x30] sm:$0xff]  ;;  %v317_v33 = vld [vmem:[%s2335_s3 + $0x48] sm:$0xff] }
   0x9   :  { %1246 = vmatprep.subr.bf16.mxu0 %v1498_v0  ;;  %v319_v34 = vld [vmem:[%s2335_s3 + $0x58] sm:$0xff]  ;;  %1277 = vmatprep.subr.bf16.mxu1 %v1276_v26  ;;  %v81_v36 = vld [vmem:[%s2333_s1 + $0x70] sm:$0xff]  ;;  %v1282_v37 = vpack.c.bf16 %v314_v32, %v312_v30  ;;  %v316_v40 = vld [vmem:[%s2335_s3 + $0x40] sm:$0xff]  ;;  %v2346_v30 = vmov 0.0  }
   0xa   :  { %1279 = vmatpush1.bf16.msra.mxu1 %v1278_v27  ;;  %v82_v38 = vld [vmem:[%s2333_s1 + $0x78] sm:$0xff]  ;;  %v1284_v39 = vpack.c.bf16 %v319_v34, %v317_v33  ;;  %v318_v41 = vld [vmem:[%s2335_s3 + $0x50] sm:$0xff]  ;;  %v83_v44 = vld [vmem:[%s2333_s1 + $0x80] sm:$0xff]  ;;  %448 = vmatprep.mubr.f32.mxu1 %v2346_v30 }
   0xb   :  { %1281 = vmatprep.subr.bf16.mxu1 %v1280_v31  ;;  %v1262_v42 = vpack.c.bf16 %v82_v38, %v81_v36  ;;  %v1286_v43 = vpack.c.bf16 %v318_v41, %v316_v40  ;;  %v84_v45 = vld [vmem:[%s2333_s1 + $0x88] sm:$0xff]  ;;  %v85_v47 = vld [vmem:[%s2333_s1 + $0x90] sm:$0xff]  ;;  %v86_v48 = vld [vmem:[%s2333_s1 + $0x98] sm:$0xff] }
   0xc   :  { %1248 = vmatpush1.bf16.msra.mxu0 %v1247_v9  ;;  %v1265_v46 = vpack.c.bf16 %v84_v45, %v83_v44  ;;  %v1268_v49 = vpack.c.bf16 %v86_v48, %v85_v47  ;;  %v87_v50 = vld [vmem:[%s2333_s1 + $0xa0] sm:$0xff]  ;;  %v88_v51 = vld [vmem:[%s2333_s1 + $0xa8] sm:$0xff]  ;;  %v89_v53 = vld [vmem:[%s2333_s1 + $0xb0] sm:$0xff] }
   0xd   :  { %1249 = vmatprep.subr.bf16.mxu0 %v1498_v0  ;;  %v1271_v52 = vpack.c.bf16 %v88_v51, %v87_v50  ;;  %v90_v54 = vld [vmem:[%s2333_s1 + $0xb8] sm:$0xff]  ;;  %v35_v56 = vld [vmem:[%s2334_s0] sm:$0xff]  ;;  %v37_v58 = vld [vmem:[%s2334_s0 + $0x10] sm:$0xff] }
   0xe   :  { %1283 = vmatpush1.bf16.msra.mxu1 %v1282_v37  ;;  %v1274_v55 = vpack.c.bf16 %v90_v54, %v89_v53  ;;  %v38_v57 = vld [vmem:[%s2334_s0 + $0x18] sm:$0xff]  ;;  %v40_v59 = vld [vmem:[%s2334_s0 + $0x28] sm:$0xff]  ;;  %v39_v60 = vld [vmem:[%s2334_s0 + $0x20] sm:$0xff] }
   0xf   :  { %1285 = vmatprep.subr.bf16.mxu1 %v1284_v39  ;;  %v42_v61 = vld [vmem:[%s2334_s0 + $0x38] sm:$0xff]  ;;  %v41_v62 = vld [vmem:[%s2334_s0 + $0x30] sm:$0xff]  ;;  %v44_v63 = vld [vmem:[%s2334_s0 + $0x48] sm:$0xff] }
  0x10   :  { %1251 = vmatpush1.bf16.msra.mxu0 %v1250_v13  ;;  %v43_v1 = vld [vmem:[%s2334_s0 + $0x40] sm:$0xff]  ;;  %v46_v2 = vld [vmem:[%s2334_s0 + $0x58] sm:$0xff]  ;;  %v45_v3 = vld [vmem:[%s2334_s0 + $0x50] sm:$0xff] }
  0x11   :  { %1252 = vmatprep.subr.bf16.mxu0 %v1498_v0  ;;  %v48_v4 = vld [vmem:[%s2334_s0 + $0x68] sm:$0xff]  ;;  %v47_v5 = vld [vmem:[%s2334_s0 + $0x60] sm:$0xff]  ;;  %v50_v6 = vld [vmem:[%s2334_s0 + $0x78] sm:$0xff] }
  0x12   :  { %1287 = vmatpush1.bf16.msra.mxu1 %v1286_v43  ;;  %v49_v7 = vld [vmem:[%s2334_s0 + $0x70] sm:$0xff]  ;;  %v52_v8 = vld [vmem:[%s2334_s0 + $0x88] sm:$0xff]  ;;  %v51_v9 = vld [vmem:[%s2334_s0 + $0x80] sm:$0xff] }
  0x13   :  { %v54_v10 = vld [vmem:[%s2334_s0 + $0x98] sm:$0xff]  ;;  %v53_v11 = vld [vmem:[%s2334_s0 + $0x90] sm:$0xff]  ;;  %v56_v12 = vld [vmem:[%s2334_s0 + $0xa8] sm:$0xff] }
  0x14   :  { %1254 = vmatpush1.bf16.msra.mxu0 %v1253_v16  ;;  %v55_v13 = vld [vmem:[%s2334_s0 + $0xa0] sm:$0xff]  ;;  %v58_v14 = vld [vmem:[%s2334_s0 + $0xb8] sm:$0xff]  ;;  %v57_v15 = vld [vmem:[%s2334_s0 + $0xb0] sm:$0xff] }
  0x15   :  { %1255 = vmatprep.subr.bf16.mxu0 %v1498_v0  ;;  %v60_v16 = vld [vmem:[%s2334_s0 + $0xc8] sm:$0xff]  ;;  %v59_v17 = vld [vmem:[%s2334_s0 + $0xc0] sm:$0xff]  ;;  %v62_v18 = vld [vmem:[%s2334_s0 + $0xd8] sm:$0xff] }
  0x16   :  { %v61_v19 = vld [vmem:[%s2334_s0 + $0xd0] sm:$0xff]  ;;  %v64_v20 = vld [vmem:[%s2334_s0 + $0xe8] sm:$0xff]  ;;  %v63_v21 = vld [vmem:[%s2334_s0 + $0xe0] sm:$0xff] }
  0x17   :  { %v65_v23 = vld [vmem:[%s2334_s0 + $0xf0] sm:$0xff]  ;;  %v321_v24 = vld [vmem:[%s2335_s3 + $0x68] sm:$0xff]  ;;  %v323_v25 = vld [vmem:[%s2335_s3 + $0x78] sm:$0xff] }
  0x18   :  { %1257 = vmatpush1.bf16.msra.mxu0 %v1256_v22  ;;  %v66_v22 = vld [vmem:[%s2334_s0 + $0xf8] sm:$0xff]  ;;  %v1288_v26 = vpack.c.bf16 %v323_v25, %v321_v24  ;;  %v320_v27 = vld [vmem:[%s2335_s3 + $0x60] sm:$0xff]  ;;  %v322_v28 = vld [vmem:[%s2335_s3 + $0x70] sm:$0xff] }
  0x19   :  { %1258 = vmatprep.subr.bf16.mxu0 %v1498_v0  ;;  %v1290_v29 = vpack.c.bf16 %v322_v28, %v320_v27  ;;  %v1808_v31 = vld [vmem:[%s2336_s2] ss:$0 sm:$0xff] }
  0x1a   :  { %1289 = vmatprep.subr.bf16.mxu1 %v1288_v26 }
  0x1b   :  { %1291 = vmatpush1.bf16.msra.mxu1 %v1290_v29 }
  0x1c   :  { %1260 = vmatpush1.bf16.msra.mxu0 %v1259_v35 }
  0x1d   :  { %1261 = vmatprep.subr.bf16.mxu0 %v1498_v0 }
  0x20   :  { %1263 = vmatpush1.bf16.msra.mxu0 %v1262_v42 }
  0x21   :  { %1264 = vmatprep.subr.bf16.mxu0 %v1498_v0 }
  0x24   :  { %1266 = vmatpush1.bf16.msra.mxu0 %v1265_v46 }
  0x25   :  { %1267 = vmatprep.subr.bf16.mxu0 %v1498_v0 }
  0x28   :  { %1269 = vmatpush1.bf16.msra.mxu0 %v1268_v49 }
  0x29   :  { %1270 = vmatprep.subr.bf16.mxu0 %v1498_v0 }
  0x2c   :  { %1272 = vmatpush1.bf16.msra.mxu0 %v1271_v52 }
  0x2d   :  { %1273 = vmatprep.subr.bf16.mxu0 %v1498_v0 }
  0x30   :  { %1275 = vmatpush1.bf16.msra.mxu0 %v1274_v55 }
  0x31   :  { %1324 = vmatprep.subr.bf16.mxu0 %v1498_v0 }
  0x33   :  { %212 = vmatmul.mubr.f32.vlgmr.msra.gmra.mrb[0].mxu0 %v35_v56 }
  0x34   :  { %1154 = vmatprep.mubr.msk.f32.mxu0 %vm98_vm0, %v38_v57 }
  0x37   :  { %217 = vmatmul.mubr.f32.gmra.mrb[2].mxu0 %v37_v58 }
  0x38   :  { %1155 = vmatprep.mubr.msk.f32.mxu0 %vm98_vm0, %v40_v59 }
  0x3b   :  { %222 = vmatmul.mubr.f32.gmra.mrb[4].mxu0 %v39_v60 }
  0x3c   :  { %1156 = vmatprep.mubr.msk.f32.mxu0 %vm98_vm0, %v42_v61 }
  0x3f   :  { %227 = vmatmul.mubr.f32.gmra.mrb[6].mxu0 %v41_v62 }
  0x40   :  { %1157 = vmatprep.mubr.msk.f32.mxu0 %vm98_vm0, %v44_v63 }
  0x43   :  { %232 = vmatmul.mubr.f32.gmra.mrb[8].mxu0 %v43_v1 }
  0x44   :  { %1158 = vmatprep.mubr.msk.f32.mxu0 %vm98_vm0, %v46_v2 }
  0x47   :  { %237 = vmatmul.mubr.f32.gmra.mrb[10].mxu0 %v45_v3 }
  0x48   :  { %1159 = vmatprep.mubr.msk.f32.mxu0 %vm98_vm0, %v48_v4 }
  0x4b   :  { %242 = vmatmul.mubr.f32.gmra.mrb[12].mxu0 %v47_v5 }
  0x4c   :  { %1160 = vmatprep.mubr.msk.f32.mxu0 %vm98_vm0, %v50_v6 }
  0x4f   :  { %247 = vmatmul.mubr.f32.gmra.mrb[14].mxu0 %v49_v7 }
  0x50   :  { %1161 = vmatprep.mubr.msk.f32.mxu0 %vm98_vm0, %v52_v8 }
  0x53   :  { %252 = vmatmul.mubr.f32.gmra.mrb[16].mxu0 %v51_v9 }
  0x54   :  { %1162 = vmatprep.mubr.msk.f32.mxu0 %vm98_vm0, %v54_v10 }
  0x57   :  { %257 = vmatmul.mubr.f32.gmra.mrb[18].mxu0 %v53_v11 }
  0x58   :  { %1163 = vmatprep.mubr.msk.f32.mxu0 %vm98_vm0, %v56_v12 }
  0x5b   :  { %262 = vmatmul.mubr.f32.gmra.mrb[20].mxu0 %v55_v13 }
  0x5c   :  { %1164 = vmatprep.mubr.msk.f32.mxu0 %vm98_vm0, %v58_v14 }
  0x5f   :  { %267 = vmatmul.mubr.f32.gmra.mrb[22].mxu0 %v57_v15 }
  0x60   :  { %1165 = vmatprep.mubr.msk.f32.mxu0 %vm98_vm0, %v60_v16 }
  0x63   :  { %272 = vmatmul.mubr.f32.gmra.mrb[24].mxu0 %v59_v17 }
  0x64   :  { %1166 = vmatprep.mubr.msk.f32.mxu0 %vm98_vm0, %v62_v18 }
  0x67   :  { %277 = vmatmul.mubr.f32.gmra.mrb[26].mxu0 %v61_v19 }
  0x68   :  { %1167 = vmatprep.mubr.msk.f32.mxu0 %vm98_vm0, %v64_v20 }
  0x6b   :  { %282 = vmatmul.mubr.f32.gmra.mrb[28].mxu0 %v63_v21 }
  0x6c   :  { %1168 = vmatprep.mubr.msk.f32.mxu0 %vm98_vm0, %v66_v22 }
  0x6f   :  { %287 = vmatmul.mubr.f32.gmra.mrb[30].mxu0 %v65_v23 }
 0x106   :  { %v213_v32 = vpop.f32.mrb[0].mxu0 }
 0x107   :  { %v214_v33 = vadd.f32 %v1808_v31, %v213_v32  ;;  %v215_v34 = vpop.f32.mrb[1].mxu0 }
 0x109   :  { %v292_v35 = vmax.f32 %v214_v33, 0.0 }
 0x10a   :  { %v218_v36 = vpop.f32.mrb[2].mxu0 }
 0x10b   :  { %v219_v37 = vadd.f32 %v1808_v31, %v218_v36  ;;  %v220_v38 = vpop.f32.mrb[3].mxu0  ;;  %1169 = vmatmul.mubr.msk.f32.vlgmr.msra.gmra.mrb[0].mxu1 %vm98_vm0, %v292_v35 }
 0x10c   :  { %454 = vmatprep.mubr.f32.mxu1 %v2346_v30 }
 0x10d   :  { %v293_v39 = vmax.f32 %v219_v37, 0.0 }
 0x10e   :  { %v223_v40 = vpop.f32.mrb[4].mxu0 }
 0x10f   :  { %v1814_v41 = vpack.c.bf16 %v293_v39, %v292_v35  ;;  %v224_v42 = vadd.f32 %v1808_v31, %v223_v40  ;;  %v225_v43 = vpop.f32.mrb[5].mxu0  ;;  %1170 = vmatmul.mubr.msk.f32.gmra.mrb[2].mxu1 %vm98_vm0, %v293_v39 }
 0x110   :  { %460 = vmatprep.mubr.f32.mxu1 %v2346_v30 }
 0x111   :  { %v294_v44 = vmax.f32 %v224_v42, 0.0 }
 0x112   :  { %v228_v45 = vpop.f32.mrb[6].mxu0 }
 0x113   :  { %v229_v46 = vadd.f32 %v1808_v31, %v228_v45  ;;  %v230_v47 = vpop.f32.mrb[7].mxu0  ;;  %1171 = vmatmul.mubr.msk.f32.gmra.mrb[4].mxu1 %vm98_vm0, %v294_v44 }
 0x114   :  { %466 = vmatprep.mubr.f32.mxu1 %v2346_v30 }
 0x115   :  { %v295_v48 = vmax.f32 %v229_v46, 0.0 }
 0x116   :  { %v233_v49 = vpop.f32.mrb[8].mxu0 }
 0x117   :  { %v1822_v50 = vpack.c.bf16 %v295_v48, %v294_v44  ;;  %v234_v51 = vadd.f32 %v1808_v31, %v233_v49  ;;  %v235_v52 = vpop.f32.mrb[9].mxu0  ;;  %1172 = vmatmul.mubr.msk.f32.gmra.mrb[6].mxu1 %vm98_vm0, %v295_v48  ;;  %v326_v44 = vlaneseq }
 0x118   :  { %472 = vmatprep.mubr.f32.mxu1 %v2346_v30 }
 0x119   :  { %v296_v53 = vmax.f32 %v234_v51, 0.0  ;;  %v1874_v45 = vshrl.u32 %v326_v44, 7 }
 0x11a   :  { %v238_v54 = vpop.f32.mrb[10].mxu0 }
 0x11b   :  { %v239_v55 = vadd.f32 %v1808_v31, %v238_v54  ;;  %v240_v56 = vpop.f32.mrb[11].mxu0  ;;  %1173 = vmatmul.mubr.msk.f32.gmra.mrb[8].mxu1 %vm98_vm0, %v296_v53  ;;  %2353 = vst [vmem:[#allocation6_spill] sm:$0xff] %v1874_v45  ;;  %v2344_v46 = vsub.s32 1, %v1874_v45  ;;  %v2345_v47 = vsub.s32 0, %v1874_v45 }
 0x11c   :  { %478 = vmatprep.mubr.f32.mxu1 %v2346_v30 }
 0x11d   :  { %v297_v57 = vmax.f32 %v239_v55, 0.0 }
 0x11e   :  { %v243_v58 = vpop.f32.mrb[12].mxu0 }
 0x11f   :  { %v1830_v59 = vpack.c.bf16 %v297_v57, %v296_v53  ;;  %v244_v60 = vadd.f32 %v1808_v31, %v243_v58  ;;  %v245_v61 = vpop.f32.mrb[13].mxu0  ;;  %1174 = vmatmul.mubr.msk.f32.gmra.mrb[10].mxu1 %vm98_vm0, %v297_v57 }
 0x120   :  { %484 = vmatprep.mubr.f32.mxu1 %v2346_v30 }
 0x121   :  { %v298_v62 = vmax.f32 %v244_v60, 0.0 }
 0x122   :  { %v248_v63 = vpop.f32.mrb[14].mxu0 }
 0x123   :  { %v249_v1 = vadd.f32 %v1808_v31, %v248_v63  ;;  %v250_v2 = vpop.f32.mrb[15].mxu0  ;;  %1175 = vmatmul.mubr.msk.f32.gmra.mrb[12].mxu1 %vm98_vm0, %v298_v62 }
 0x124   :  { %490 = vmatprep.mubr.f32.mxu1 %v2346_v30 }
 0x125   :  { %v299_v3 = vmax.f32 %v249_v1, 0.0 }
 0x126   :  { %v253_v4 = vpop.f32.mrb[16].mxu0 }
 0x127   :  { %v1838_v5 = vpack.c.bf16 %v299_v3, %v298_v62  ;;  %v254_v6 = vadd.f32 %v1808_v31, %v253_v4  ;;  %v255_v7 = vpop.f32.mrb[17].mxu0  ;;  %1176 = vmatmul.mubr.msk.f32.gmra.mrb[14].mxu1 %vm98_vm0, %v299_v3 }
 0x128   :  { %496 = vmatprep.mubr.f32.mxu1 %v2346_v30 }
 0x129   :  { %v300_v8 = vmax.f32 %v254_v6, 0.0 }
 0x12a   :  { %v258_v9 = vpop.f32.mrb[18].mxu0 }
 0x12b   :  { %v259_v10 = vadd.f32 %v1808_v31, %v258_v9  ;;  %v260_v11 = vpop.f32.mrb[19].mxu0  ;;  %1177 = vmatmul.mubr.msk.f32.gmra.mrb[16].mxu1 %vm98_vm0, %v300_v8 }
 0x12c   :  { %502 = vmatprep.mubr.f32.mxu1 %v2346_v30 }
 0x12d   :  { %v301_v12 = vmax.f32 %v259_v10, 0.0 }
 0x12e   :  { %v263_v13 = vpop.f32.mrb[20].mxu0 }
 0x12f   :  { %v1846_v14 = vpack.c.bf16 %v301_v12, %v300_v8  ;;  %v264_v15 = vadd.f32 %v1808_v31, %v263_v13  ;;  %v265_v16 = vpop.f32.mrb[21].mxu0  ;;  %1178 = vmatmul.mubr.msk.f32.gmra.mrb[18].mxu1 %vm98_vm0, %v301_v12 }
 0x130   :  { %508 = vmatprep.mubr.f32.mxu1 %v2346_v30 }
 0x131   :  { %2349 = vst [vmem:[#allocation2_spill] sm:$0xff] %v1846_v14  ;;  %v302_v17 = vmax.f32 %v264_v15, 0.0  ;;  %v810_v14 = vld [vmem:[%s2338_s7 + $0x60] sm:$0xff] }
 0x132   :  { %v268_v18 = vpop.f32.mrb[22].mxu0 }
 0x133   :  { %v269_v19 = vadd.f32 %v1808_v31, %v268_v18  ;;  %v270_v20 = vpop.f32.mrb[23].mxu0  ;;  %1179 = vmatmul.mubr.msk.f32.gmra.mrb[20].mxu1 %vm98_vm0, %v302_v17 }
 0x134   :  { %514 = vmatprep.mubr.f32.mxu1 %v2346_v30 }
 0x135   :  { %v303_v21 = vmax.f32 %v269_v19, 0.0 }
 0x136   :  { %v273_v22 = vpop.f32.mrb[24].mxu0 }
 0x137   :  { %v1854_v23 = vpack.c.bf16 %v303_v21, %v302_v17  ;;  %v274_v24 = vadd.f32 %v1808_v31, %v273_v22  ;;  %v275_v25 = vpop.f32.mrb[25].mxu0  ;;  %1180 = vmatmul.mubr.msk.f32.gmra.mrb[22].mxu1 %vm98_vm0, %v303_v21 }
 0x138   :  { %520 = vmatprep.mubr.f32.mxu1 %v2346_v30 }
 0x139   :  { %2350 = vst [vmem:[#allocation3_spill] sm:$0xff] %v1854_v23  ;;  %v304_v26 = vmax.f32 %v274_v24, 0.0 }
 0x13a   :  { %v278_v27 = vpop.f32.mrb[26].mxu0 }
 0x13b   :  { %v279_v28 = vadd.f32 %v1808_v31, %v278_v27  ;;  %v280_v29 = vpop.f32.mrb[27].mxu0  ;;  %1181 = vmatmul.mubr.msk.f32.gmra.mrb[24].mxu1 %vm98_vm0, %v304_v26 }
 0x13c   :  { %526 = vmatprep.mubr.f32.mxu1 %v2346_v30 }
 0x13d   :  { %v305_v32 = vmax.f32 %v279_v28, 0.0 }
 0x13e   :  { %v283_v33 = vpop.f32.mrb[28].mxu0 }
 0x13f   :  { %v1862_v34 = vpack.c.bf16 %v305_v32, %v304_v26  ;;  %v284_v35 = vadd.f32 %v1808_v31, %v283_v33  ;;  %v285_v36 = vpop.f32.mrb[29].mxu0  ;;  %1182 = vmatmul.mubr.msk.f32.gmra.mrb[26].mxu1 %vm98_vm0, %v305_v32 }
 0x140   :  { %532 = vmatprep.mubr.f32.mxu1 %v2346_v30 }
 0x141   :  { %2351 = vst [vmem:[#allocation4_spill] sm:$0xff] %v1862_v34  ;;  %v306_v37 = vmax.f32 %v284_v35, 0.0 }
 0x142   :  { %v288_v38 = vpop.f32.mrb[30].mxu0 }
 0x143   :  { %v289_v39 = vadd.f32 %v1808_v31, %v288_v38  ;;  %v290_v40 = vpop.f32.mrb[31].mxu0  ;;  %1183 = vmatmul.mubr.msk.f32.gmra.mrb[28].mxu1 %vm98_vm0, %v306_v37  ;;  %v324_v31 = vld [vmem:[%s2337_s4] sm:$0x3] }
 0x144   :  { %538 = vmatprep.mubr.f32.mxu1 %v2346_v30  ;;  %v1883_v48 = vrot.slane %v324_v31, %v2344_v46  ;;  %v1887_v49 = vrot.slane %v324_v31, %v2345_v47 }
 0x145   :  { %v307_v42 = vmax.f32 %v289_v39, 0.0 }
 0x147   :  { %v1870_v43 = vpack.c.bf16 %v307_v42, %v306_v37  ;;  %1184 = vmatmul.mubr.msk.f32.gmra.mrb[30].mxu1 %vm98_vm0, %v307_v42 }
 0x148   :  { %791 = vmatprep.mubr.f32.mxu1 %v2346_v30 }
 0x149   :  { %2352 = vst [vmem:[#allocation5_spill] sm:$0xff] %v1870_v43 }
 0x1de   :  { %v450_v51 = vpop.f32.mrb[0].mxu1 }
 0x1df   :  { %v452_v52 = vpop.f32.mrb[1].mxu1  ;;  %v1893_v54 = vadd.f32 %v450_v51, %v1887_v49 }
 0x1e0   :  { %v1890_v53 = vadd.f32 %v452_v52, %v1883_v48 }
 0x1e2   :  { %v456_v55 = vpop.f32.mrb[2].mxu1  ;;  %v545_v56 = vsel %vm98_vm0, %v1890_v53, -inf }
 0x1e3   :  { %v458_v57 = vpop.f32.mrb[3].mxu1  ;;  %v546_v58 = vmax.f32 %v1893_v54, %v545_v56  ;;  %v1902_v61 = vadd.f32 %v456_v55, %v1887_v49 }
 0x1e4   :  { %v1899_v60 = vadd.f32 %v458_v57, %v1883_v48 }
 0x1e5   :  { %547 = vmax.xlane.f32.xlu0 %v546_v58 }
 0x1e6   :  { %v462_v62 = vpop.f32.mrb[4].mxu1  ;;  %v549_v63 = vsel %vm98_vm0, %v1899_v60, -inf }
 0x1e7   :  { %v464_v1 = vpop.f32.mrb[5].mxu1  ;;  %v550_v2 = vmax.f32 %v1902_v61, %v549_v63  ;;  %v1911_v4 = vadd.f32 %v462_v62, %v1887_v49 }
 0x1e8   :  { %v1908_v3 = vadd.f32 %v464_v1, %v1883_v48 }
 0x1e9   :  { %551 = vmax.xlane.f32.xlu0 %v550_v2 }
 0x1ea   :  { %v468_v6 = vpop.f32.mrb[6].mxu1  ;;  %v553_v7 = vsel %vm98_vm0, %v1908_v3, -inf }
 0x1eb   :  { %v470_v8 = vpop.f32.mrb[7].mxu1  ;;  %v554_v9 = vmax.f32 %v1911_v4, %v553_v7  ;;  %v1920_v11 = vadd.f32 %v468_v6, %v1887_v49 }
 0x1ec   :  { %v1917_v10 = vadd.f32 %v470_v8, %v1883_v48 }
 0x1ed   :  { %555 = vmax.xlane.f32.xlu1 %v554_v9 }
 0x1ee   :  { %v474_v12 = vpop.f32.mrb[8].mxu1  ;;  %v557_v13 = vsel %vm98_vm0, %v1917_v10, -inf }
 0x1ef   :  { %v476_v15 = vpop.f32.mrb[9].mxu1  ;;  %v558_v16 = vmax.f32 %v1920_v11, %v557_v13  ;;  %v1929_v18 = vadd.f32 %v474_v12, %v1887_v49 }
 0x1f0   :  { %v1926_v17 = vadd.f32 %v476_v15, %v1883_v48 }
 0x1f1   :  { %559 = vmax.xlane.f32.xlu1 %v558_v16 }
 0x1f2   :  { %v480_v19 = vpop.f32.mrb[10].mxu1  ;;  %v561_v20 = vsel %vm98_vm0, %v1926_v17, -inf }
 0x1f3   :  { %v482_v21 = vpop.f32.mrb[11].mxu1  ;;  %v562_v22 = vmax.f32 %v1929_v18, %v561_v20  ;;  %v1938_v25 = vadd.f32 %v480_v19, %v1887_v49 }
 0x1f4   :  { %v1935_v24 = vadd.f32 %v482_v21, %v1883_v48 }
 0x1f5   :  { %563 = vmax.xlane.f32.xlu0 %v562_v22 }
 0x1f6   :  { %v486_v26 = vpop.f32.mrb[12].mxu1  ;;  %v565_v27 = vsel %vm98_vm0, %v1935_v24, -inf }
 0x1f7   :  { %v488_v28 = vpop.f32.mrb[13].mxu1  ;;  %v566_v29 = vmax.f32 %v1938_v25, %v565_v27  ;;  %v1947_v33 = vadd.f32 %v486_v26, %v1887_v49 }
 0x1f8   :  { %v1944_v32 = vadd.f32 %v488_v28, %v1883_v48 }
 0x1f9   :  { %567 = vmax.xlane.f32.xlu1 %v566_v29 }
 0x1fa   :  { %v492_v35 = vpop.f32.mrb[14].mxu1  ;;  %v569_v36 = vsel %vm98_vm0, %v1944_v32, -inf }
 0x1fb   :  { %v494_v37 = vpop.f32.mrb[15].mxu1  ;;  %v570_v38 = vmax.f32 %v1947_v33, %v569_v36  ;;  %v1956_v40 = vadd.f32 %v492_v35, %v1887_v49 }
 0x1fc   :  { %v1953_v39 = vadd.f32 %v494_v37, %v1883_v48 }
 0x1fd   :  { %571 = vmax.xlane.f32.xlu0 %v570_v38 }
 0x1fe   :  { %v498_v42 = vpop.f32.mrb[16].mxu1  ;;  %v573_v44 = vsel %vm98_vm0, %v1953_v39, -inf }
 0x1ff   :  { %v500_v31 = vpop.f32.mrb[17].mxu1  ;;  %v574_v51 = vmax.f32 %v1956_v40, %v573_v44  ;;  %v1965_v55 = vadd.f32 %v498_v42, %v1887_v49 }
 0x200   :  { %v1962_v52 = vadd.f32 %v500_v31, %v1883_v48 }
 0x201   :  { %575 = vmax.xlane.f32.xlu1 %v574_v51 }
 0x202   :  { %v504_v56 = vpop.f32.mrb[18].mxu1  ;;  %v577_v57 = vsel %vm98_vm0, %v1962_v52, -inf }
 0x203   :  { %v506_v58 = vpop.f32.mrb[19].mxu1  ;;  %v578_v62 = vmax.f32 %v1965_v55, %v577_v57  ;;  %v1974_v1 = vadd.f32 %v504_v56, %v1887_v49 }
 0x204   :  { %v1971_v63 = vadd.f32 %v506_v58, %v1883_v48 }
 0x205   :  { %579 = vmax.xlane.f32.xlu0 %v578_v62 }
 0x206   :  { %v510_v2 = vpop.f32.mrb[20].mxu1  ;;  %v581_v6 = vsel %vm98_vm0, %v1971_v63, -inf }
 0x207   :  { %v512_v7 = vpop.f32.mrb[21].mxu1  ;;  %v582_v8 = vmax.f32 %v1974_v1, %v581_v6  ;;  %v1983_v12 = vadd.f32 %v510_v2, %v1887_v49 }
 0x208   :  { %v1980_v9 = vadd.f32 %v512_v7, %v1883_v48 }
 0x209   :  { %583 = vmax.xlane.f32.xlu1 %v582_v8 }
 0x20a   :  { %v516_v13 = vpop.f32.mrb[22].mxu1  ;;  %v585_v15 = vsel %vm98_vm0, %v1980_v9, -inf }
 0x20b   :  { %v518_v16 = vpop.f32.mrb[23].mxu1  ;;  %v586_v19 = vmax.f32 %v1983_v12, %v585_v15  ;;  %v1992_v21 = vadd.f32 %v516_v13, %v1887_v49 }
 0x20c   :  { %v1989_v20 = vadd.f32 %v518_v16, %v1883_v48 }
 0x20d   :  { %587 = vmax.xlane.f32.xlu0 %v586_v19 }
 0x20e   :  { %v522_v22 = vpop.f32.mrb[24].mxu1  ;;  %v589_v26 = vsel %vm98_vm0, %v1989_v20, -inf }
 0x20f   :  { %v524_v27 = vpop.f32.mrb[25].mxu1  ;;  %v590_v28 = vmax.f32 %v1992_v21, %v589_v26  ;;  %v2001_v35 = vadd.f32 %v522_v22, %v1887_v49 }
 0x210   :  { %v1998_v29 = vadd.f32 %v524_v27, %v1883_v48 }
 0x211   :  { %591 = vmax.xlane.f32.xlu1 %v590_v28 }
 0x212   :  { %v528_v36 = vpop.f32.mrb[26].mxu1  ;;  %v593_v37 = vsel %vm98_vm0, %v1998_v29, -inf }
 0x213   :  { %v530_v38 = vpop.f32.mrb[27].mxu1  ;;  %v594_v42 = vmax.f32 %v2001_v35, %v593_v37  ;;  %v2010_v31 = vadd.f32 %v528_v36, %v1887_v49 }
 0x214   :  { %v2007_v44 = vadd.f32 %v530_v38, %v1883_v48  ;;  %v800_v38 = vld [vmem:[%s2338_s7 + $0x10] sm:$0xff] }
 0x215   :  { %595 = vmax.xlane.f32.xlu0 %v594_v42 }
 0x216   :  { %v534_v51 = vpop.f32.mrb[28].mxu1  ;;  %v597_v56 = vsel %vm98_vm0, %v2007_v44, -inf }
 0x217   :  { %v536_v57 = vpop.f32.mrb[29].mxu1  ;;  %v598_v58 = vmax.f32 %v2010_v31, %v597_v56  ;;  %v2019_v2 = vadd.f32 %v534_v51, %v1887_v49  ;;  %v801_v56 = vld [vmem:[%s2338_s7 + $0x18] sm:$0xff] }
 0x218   :  { %v2016_v62 = vadd.f32 %v536_v57, %v1883_v48 }
 0x219   :  { %599 = vmax.xlane.f32.xlu1 %v598_v58  ;;  %v1328_v58 = vpack.c.bf16 %v801_v56, %v800_v38  ;;  %v806_v56 = vld [vmem:[%s2338_s7 + $0x40] sm:$0xff] }
 0x21a   :  { %v540_v6 = vpop.f32.mrb[30].mxu1  ;;  %v601_v7 = vsel %vm98_vm0, %v2016_v62, -inf }
 0x21b   :  { %v542_v8 = vpop.f32.mrb[31].mxu1  ;;  %v602_v13 = vmax.f32 %v2019_v2, %v601_v7  ;;  %v2028_v16 = vadd.f32 %v540_v6, %v1887_v49  ;;  %v799_v49 = vld [vmem:[%s2338_s7 + $0x8] sm:$0xff]  ;;  %v802_v6 = vld [vmem:[%s2338_s7 + $0x20] sm:$0xff] }
 0x21c   :  { %v2025_v15 = vadd.f32 %v542_v8, %v1883_v48  ;;  %v798_v48 = vld [vmem:[%s2338_s7] sm:$0xff]  ;;  %v803_v7 = vld [vmem:[%s2338_s7 + $0x28] sm:$0xff] }
 0x21d   :  { %603 = vmax.xlane.f32.xlu0 %v602_v13  ;;  %v1325_v51 = vpack.c.bf16 %v799_v49, %v798_v48  ;;  %v805_v48 = vld [vmem:[%s2338_s7 + $0x38] sm:$0xff] }
 0x21e   :  { %v605_v19 = vsel %vm98_vm0, %v2025_v15, -inf }
 0x21f   :  { %v606_v22 = vmax.f32 %v2028_v16, %v605_v19  ;;  %1326 = vmatpush1.bf16.msra.mxu0 %v1325_v51  ;;  %v1331_v19 = vpack.c.bf16 %v803_v7, %v802_v6 }
 0x220   :  { %1327 = vmatprep.subr.bf16.mxu0 %v1498_v0 }
 0x221   :  { %607 = vmax.xlane.f32.xlu1 %v606_v22  ;;  %v804_v22 = vld [vmem:[%s2338_s7 + $0x30] sm:$0xff] }
 0x222   :  { %v1334_v51 = vpack.c.bf16 %v805_v48, %v804_v22  ;;  %v809_v22 = vld [vmem:[%s2338_s7 + $0x58] sm:$0xff] }
 0x223   :  { %1329 = vmatpush1.bf16.msra.mxu0 %v1328_v58  ;;  %v807_v58 = vld [vmem:[%s2338_s7 + $0x48] sm:$0xff] }
 0x224   :  { %1330 = vmatprep.subr.bf16.mxu0 %v1498_v0  ;;  %v1337_v46 = vpack.c.bf16 %v807_v58, %v806_v56 }
 0x227   :  { %1332 = vmatpush1.bf16.msra.mxu0 %v1331_v19  ;;  %v808_v19 = vld [vmem:[%s2338_s7 + $0x50] sm:$0xff] }
 0x228   :  { %1333 = vmatprep.subr.bf16.mxu0 %v1498_v0 }
 0x22b   :  { %1335 = vmatpush1.bf16.msra.mxu0 %v1334_v51  ;;  %v1340_v51 = vpack.c.bf16 %v809_v22, %v808_v19  ;;  %v817_v19 = vld [vmem:[%s2338_s7 + $0x98] sm:$0xff] }
 0x22c   :  { %1336 = vmatprep.subr.bf16.mxu0 %v1498_v0 }
 0x22f   :  { %1338 = vmatpush1.bf16.msra.mxu0 %v1337_v46 }
 0x230   :  { %1339 = vmatprep.subr.bf16.mxu0 %v1498_v0 }
 0x233   :  { %1341 = vmatpush1.bf16.msra.mxu0 %v1340_v51 }
 0x234   :  { %1342 = vmatprep.subr.bf16.mxu0 %v1498_v0 }
 0x272   :  { %v548_v26 = vpop.xlane.xlu0 %547 }
 0x276   :  { %v552_v28 = vpop.xlane.xlu0 %551 }
 0x27a   :  { %v556_v27 = vpop.xlane.xlu1 %555 }
 0x27e   :  { %v560_v36 = vpop.xlane.xlu1 %559 }
 0x282   :  { %v564_v37 = vpop.xlane.xlu0 %563 }
 0x283   :  { %v609_v30 = vmax.f32 %v548_v26, %v564_v37  ;;  %v811_v26 = vld [vmem:[%s2338_s7 + $0x68] sm:$0xff] }
 0x284   :  { %v1343_v46 = vpack.c.bf16 %v811_v26, %v810_v14  ;;  %v814_v14 = vld [vmem:[%s2338_s7 + $0x80] sm:$0xff] }
 0x286   :  { %v568_v42 = vpop.xlane.xlu1 %567  ;;  %1344 = vmatpush1.bf16.msra.mxu0 %v1343_v46 }
 0x287   :  { %v610_v47 = vmax.f32 %v552_v28, %v568_v42  ;;  %1345 = vmatprep.subr.bf16.mxu0 %v1498_v0 }
 0x28a   :  { %v572_v57 = vpop.xlane.xlu0 %571 }
 0x28b   :  { %v611_v45 = vmax.f32 %v556_v27, %v572_v57 }
 0x28e   :  { %v576_v8 = vpop.xlane.xlu1 %575 }
 0x28f   :  { %v612_v43 = vmax.f32 %v560_v36, %v576_v8 }
 0x292   :  { %v580_v13 = vpop.xlane.xlu0 %579 }
 0x293   :  { %v613_v56 = vmax.f32 %v609_v30, %v580_v13 }
 0x296   :  { %v584_v49 = vpop.xlane.xlu1 %583 }
 0x297   :  { %v614_v34 = vmax.f32 %v610_v47, %v584_v49 }
 0x29a   :  { %v588_v38 = vpop.xlane.xlu0 %587 }
 0x29b   :  { %v615_v28 = vmax.f32 %v611_v45, %v588_v38 }
 0x29e   :  { %v592_v6 = vpop.xlane.xlu1 %591 }
 0x29f   :  { %v616_v42 = vmax.f32 %v612_v43, %v592_v6  ;;  %v813_v43 = vld [vmem:[%s2338_s7 + $0x78] sm:$0xff] }
 0x2a2   :  { %v596_v7 = vpop.xlane.xlu0 %595 }
 0x2a3   :  { %v617_v36 = vmax.f32 %v613_v56, %v596_v7  ;;  %v816_v7 = vld [vmem:[%s2338_s7 + $0x90] sm:$0xff]  ;;  %v818_v56 = vld [vmem:[%s2338_s7 + $0xa0] sm:$0xff] }
 0x2a6   :  { %v600_v48 = vpop.xlane.xlu1 %599 }
 0x2a7   :  { %v618_v58 = vmax.f32 %v614_v34, %v600_v48  ;;  %v812_v34 = vld [vmem:[%s2338_s7 + $0x70] sm:$0xff]  ;;  %v1352_v48 = vpack.c.bf16 %v817_v19, %v816_v7 }
 0x2a8   :  { %v1346_v8 = vpack.c.bf16 %v813_v43, %v812_v34 }
 0x2a9   :  { %v621_v30 = vmax.f32 %v617_v36, %v618_v58 }
 0x2aa   :  { %v604_v23 = vpop.xlane.xlu0 %603  ;;  %1347 = vmatpush1.bf16.msra.mxu0 %v1346_v8 }
 0x2ab   :  { %v619_v47 = vmax.f32 %v615_v28, %v604_v23  ;;  %v815_v23 = vld [vmem:[%s2338_s7 + $0x88] sm:$0xff]  ;;  %1348 = vmatprep.subr.bf16.mxu0 %v1498_v0 }
 0x2ac   :  { %v1349_v38 = vpack.c.bf16 %v815_v23, %v814_v14  ;;  %v819_v28 = vld [vmem:[%s2338_s7 + $0xa8] sm:$0xff] }
 0x2ae   :  { %v608_v27 = vpop.xlane.xlu1 %607  ;;  %1350 = vmatpush1.bf16.msra.mxu0 %v1349_v38 }
 0x2af   :  { %v620_v37 = vmax.f32 %v616_v42, %v608_v27  ;;  %1351 = vmatprep.subr.bf16.mxu0 %v1498_v0  ;;  %v1355_v42 = vpack.c.bf16 %v819_v28, %v818_v56 }
 0x2b1   :  { %v622_v45 = vmax.f32 %v619_v47, %v620_v37 }
 0x2b2   :  { %1353 = vmatpush1.bf16.msra.mxu0 %v1352_v48 }
 0x2b3   :  { %v623_v57 = vmax.f32 %v621_v30, %v622_v45  ;;  %1354 = vmatprep.subr.bf16.mxu0 %v1498_v0 }
 0x2b5   :  { %v624_v13 = vrot.slane %v623_v57, 4 }
 0x2b6   :  { %1356 = vmatpush1.bf16.msra.mxu0 %v1355_v42 }
 0x2b7   :  { %v625_v49 = vmax.f32 %v623_v57, %v624_v13  ;;  %1357 = vmatprep.subr.bf16.mxu0 %v1498_v0 }
 0x2b9   :  { %v626_v6 = vrot.slane %v625_v49, 2 }
 0x2bb   :  { %v627_v22 = vmax.f32 %v625_v49, %v626_v6 }
 0x2bd   :  { %v628_v51 = vrot.slane %v627_v22, 1 }
 0x2bf   :  { %v2108_v58 = vmax.f32 %v627_v22, %v628_v51 }
 0x2c1   :  { %v630_v26 = vsub.f32 %v1893_v54, %v2108_v58  ;;  %v631_v27 = vsub.f32 %v1890_v53, %v2108_v58  ;;  %v632_v36 = vsub.f32 %v1902_v61, %v2108_v58  ;;  %v633_v47 = vsub.f32 %v1899_v60, %v2108_v58 }
 0x2c2   :  { %v634_v37 = vsub.f32 %v1911_v4, %v2108_v58  ;;  %v635_v46 = vsub.f32 %v1908_v3, %v2108_v58  ;;  %v636_v54 = vsub.f32 %v1920_v11, %v2108_v58  ;;  %v637_v61 = vsub.f32 %v1917_v10, %v2108_v58 }
 0x2c3   :  { %v662_v30 = vmul.f32 1.442695, %v630_v26  ;;  %v664_v45 = vmul.f32 1.442695, %v631_v27  ;;  %v666_v53 = vmul.f32 1.442695, %v632_v36  ;;  %v638_v43 = vsub.f32 %v1929_v18, %v2108_v58 }
 0x2c4   :  { %v668_v34 = vmul.f32 1.442695, %v633_v47  ;;  %v670_v60 = vmul.f32 1.442695, %v634_v37  ;;  %v639_v4 = vsub.f32 %v1926_v17, %v2108_v58  ;;  %v672_v3 = vmul.f32 1.442695, %v635_v46 }
 0x2c5   :  { %1432 = vpow2.f32 %v662_v30  ;;  %v640_v11 = vsub.f32 %v1938_v25, %v2108_v58  ;;  %v674_v57 = vmul.f32 1.442695, %v636_v54  ;;  %v641_v8 = vsub.f32 %v1935_v24, %v2108_v58 }
 0x2c6   :  { %1434 = vpow2.f32 %v664_v45  ;;  %v676_v10 = vmul.f32 1.442695, %v637_v61  ;;  %v642_v18 = vsub.f32 %v1947_v33, %v2108_v58  ;;  %v678_v13 = vmul.f32 1.442695, %v638_v43 }
 0x2c7   :  { %1436 = vpow2.f32 %v666_v53  ;;  %v643_v17 = vsub.f32 %v1944_v32, %v2108_v58  ;;  %v680_v14 = vmul.f32 1.442695, %v639_v4  ;;  %v644_v25 = vsub.f32 %v1956_v40, %v2108_v58 }
 0x2c8   :  { %1438 = vpow2.f32 %v668_v34  ;;  %v682_v23 = vmul.f32 1.442695, %v640_v11  ;;  %v645_v24 = vsub.f32 %v1953_v39, %v2108_v58  ;;  %v684_v49 = vmul.f32 1.442695, %v641_v8 }
 0x2c9   :  { %1440 = vpow2.f32 %v670_v60  ;;  %v646_v33 = vsub.f32 %v1965_v55, %v2108_v58  ;;  %v686_v38 = vmul.f32 1.442695, %v642_v18  ;;  %v647_v32 = vsub.f32 %v1962_v52, %v2108_v58 }
 0x2ca   :  { %1442 = vpow2.f32 %v672_v3  ;;  %v688_v6 = vmul.f32 1.442695, %v643_v17  ;;  %v648_v40 = vsub.f32 %v1974_v1, %v2108_v58  ;;  %v690_v19 = vmul.f32 1.442695, %v644_v25 }
 0x2cb   :  { %1444 = vpow2.f32 %v674_v57  ;;  %v649_v39 = vsub.f32 %v1971_v63, %v2108_v58  ;;  %v692_v48 = vmul.f32 1.442695, %v645_v24  ;;  %v650_v51 = vsub.f32 %v1983_v12, %v2108_v58 }
 0x2cc   :  { %1446 = vpow2.f32 %v676_v10  ;;  %v694_v52 = vmul.f32 1.442695, %v646_v33  ;;  %v651_v28 = vsub.f32 %v1980_v9, %v2108_v58  ;;  %v696_v1 = vmul.f32 1.442695, %v647_v32 }
 0x2cd   :  { %1448 = vpow2.f32 %v678_v13  ;;  %v652_v27 = vsub.f32 %v1992_v21, %v2108_v58  ;;  %v698_v63 = vmul.f32 1.442695, %v648_v40  ;;  %v653_v12 = vsub.f32 %v1989_v20, %v2108_v58 }
 0x2ce   :  { %1450 = vpow2.f32 %v680_v14  ;;  %v700_v37 = vmul.f32 1.442695, %v649_v39  ;;  %v654_v9 = vsub.f32 %v2001_v35, %v2108_v58  ;;  %v702_v54 = vmul.f32 1.442695, %v650_v51 }
 0x2cf   :  { %v1433_v7 = vpop.eup %1432  ;;  %1452 = vpow2.f32 %v682_v23  ;;  %v655_v21 = vsub.f32 %v1998_v29, %v2108_v58  ;;  %v704_v45 = vmul.f32 1.442695, %v651_v28  ;;  %v656_v20 = vsub.f32 %v2010_v31, %v2108_v58 }
 0x2d0   :  { %v1435_v22 = vpop.eup %1434  ;;  %1454 = vpow2.f32 %v684_v49  ;;  %v706_v61 = vmul.f32 1.442695, %v652_v27  ;;  %v657_v35 = vsub.f32 %v2007_v44, %v2108_v58  ;;  %v708_v60 = vmul.f32 1.442695, %v653_v12 }
 0x2d1   :  { %v1437_v55 = vpop.eup %1436  ;;  %1456 = vpow2.f32 %v686_v38  ;;  %v658_v29 = vsub.f32 %v2019_v2, %v2108_v58  ;;  %v710_v11 = vmul.f32 1.442695, %v654_v9  ;;  %v659_v31 = vsub.f32 %v2016_v62, %v2108_v58  ;;  %v726_v9 = vld [vmem:[%s2339_s5] sm:$0x3f] }
 0x2d2   :  { %v1439_v56 = vpop.eup %1438  ;;  %1458 = vpow2.f32 %v688_v6  ;;  %v1294_v42 = vpack.c.bf16 %v1437_v55, %v1433_v7  ;;  %v712_v8 = vmul.f32 1.442695, %v655_v21  ;;  %v660_v44 = vsub.f32 %v2028_v16, %v2108_v58 }
 0x2d3   :  { %v1441_v26 = vpop.eup %1440  ;;  %1460 = vpow2.f32 %v690_v19  ;;  %v1292_v36 = vpack.c.bf16 %v1439_v56, %v1435_v22  ;;  %v714_v18 = vmul.f32 1.442695, %v656_v20  ;;  %v661_v2 = vsub.f32 %v2025_v15, %v2108_v58 }
 0x2d4   :  { %v1443_v47 = vpop.eup %1442  ;;  %1462 = vpow2.f32 %v692_v48  ;;  %v716_v14 = vmul.f32 1.442695, %v657_v35  ;;  %v718_v62 = vmul.f32 1.442695, %v658_v29  ;;  %v720_v49 = vmul.f32 1.442695, %v659_v31 }
 0x2d5   :  { %v1445_v46 = vpop.eup %1444  ;;  %1464 = vpow2.f32 %v694_v52  ;;  %1293 = vmatprep.subr.bf16.mxu1 %v1292_v36  ;;  %v722_v16 = vmul.f32 1.442695, %v660_v44  ;;  %v724_v6 = vmul.f32 1.442695, %v661_v2  ;;  %v1018_v29 = vld [vmem:[%s2341_s8 + $0x18] sm:$0xff] }
 0x2d6   :  { %v1447_v30 = vpop.eup %1446  ;;  %1466 = vpow2.f32 %v696_v1  ;;  %1295 = vmatpush1.bf16.msra.mxu1 %v1294_v42  ;;  %v1298_v4 = vpack.c.bf16 %v1445_v46, %v1441_v26  ;;  %v1022_v44 = vld [vmem:[%s2341_s8 + $0x38] sm:$0xff] }
 0x2d7   :  { %v1449_v53 = vpop.eup %1448  ;;  %1468 = vpow2.f32 %v698_v63  ;;  %v1296_v34 = vpack.c.bf16 %v1447_v30, %v1443_v47  ;;  %v2355_v30 = vld [vmem:[#allocation3_spill] sm:$0xff] }
 0x2d8   :  { %v1451_v43 = vpop.eup %1450  ;;  %1470 = vpow2.f32 %v700_v37 }
 0x2d9   :  { %v1453_v3 = vpop.eup %1452  ;;  %1472 = vpow2.f32 %v702_v54  ;;  %1297 = vmatprep.subr.bf16.mxu1 %v1296_v34  ;;  %v2354_v54 = vld [vmem:[#allocation2_spill] sm:$0xff] }
 0x2da   :  { %v1455_v57 = vpop.eup %1454  ;;  %1474 = vpow2.f32 %v704_v45  ;;  %1299 = vmatpush1.bf16.msra.mxu1 %v1298_v4  ;;  %v1302_v25 = vpack.c.bf16 %v1453_v3, %v1449_v53  ;;  %v2358_v45 = vmov 0.0   ;;  %v895_v53 = vld [vmem:[%s2340_s6] sm:$0x3]  ;;  %v1016_v3 = vld [vmem:[%s2341_s8 + $0x8] sm:$0xff] }
 0x2db   :  { %v1457_v10 = vpop.eup %1456  ;;  %1476 = vpow2.f32 %v706_v61  ;;  %v1300_v13 = vpack.c.bf16 %v1455_v57, %v1451_v43  ;;  %v1384_v31 = vpack.c.bf16 %v1018_v29, %v1016_v3 }
 0x2dc   :  { %v1459_v17 = vpop.eup %1458  ;;  %1478 = vpow2.f32 %v708_v60 }
 0x2dd   :  { %v1461_v23 = vpop.eup %1460  ;;  %1480 = vpow2.f32 %v710_v11  ;;  %1301 = vmatprep.subr.bf16.mxu1 %v1300_v13  ;;  %v1015_v11 = vld [vmem:[%s2341_s8] sm:$0xff] }
 0x2de   :  { %v1463_v24 = vpop.eup %1462  ;;  %1482 = vpow2.f32 %v712_v8  ;;  %1303 = vmatpush1.bf16.msra.mxu1 %v1302_v25  ;;  %v1306_v7 = vpack.c.bf16 %v1461_v23, %v1457_v10  ;;  %v1017_v8 = vld [vmem:[%s2341_s8 + $0x10] sm:$0xff]  ;;  %v1020_v10 = vld [vmem:[%s2341_s8 + $0x28] sm:$0xff] }
 0x2df   :  { %v1465_v33 = vpop.eup %1464  ;;  %1484 = vpow2.f32 %v714_v18  ;;  %v1304_v38 = vpack.c.bf16 %v1463_v24, %v1459_v17  ;;  %v1386_v17 = vpack.c.bf16 %v1017_v8, %v1015_v11  ;;  %v1388_v2 = vpack.c.bf16 %v1022_v44, %v1020_v10  ;;  %v1021_v25 = vld [vmem:[%s2341_s8 + $0x30] sm:$0xff]  ;;  %v1024_v23 = vld [vmem:[%s2341_s8 + $0x48] sm:$0xff] }
 0x2e0   :  { %v1467_v32 = vpop.eup %1466  ;;  %1486 = vpow2.f32 %v716_v14  ;;  %v1019_v14 = vld [vmem:[%s2341_s8 + $0x20] sm:$0xff] }
 0x2e1   :  { %v1469_v15 = vpop.eup %1468  ;;  %1488 = vpow2.f32 %v718_v62  ;;  %1305 = vmatprep.subr.bf16.mxu1 %v1304_v38  ;;  %v1026_v62 = vld [vmem:[%s2341_s8 + $0x58] sm:$0xff]  ;;  %v1023_v38 = vld [vmem:[%s2341_s8 + $0x40] sm:$0xff] }
 0x2e2   :  { %v1471_v58 = vpop.eup %1470  ;;  %1490 = vpow2.f32 %v720_v49  ;;  %1307 = vmatpush1.bf16.msra.mxu1 %v1306_v7  ;;  %v1310_v39 = vpack.c.bf16 %v1469_v15, %v1465_v33  ;;  %v1390_v33 = vpack.c.bf16 %v1021_v25, %v1019_v14 }
 0x2e3   :  { %v1473_v40 = vpop.eup %1472  ;;  %1492 = vpow2.f32 %v722_v16  ;;  %v1308_v19 = vpack.c.bf16 %v1471_v58, %v1467_v32  ;;  %v1392_v16 = vpack.c.bf16 %v1026_v62, %v1024_v23  ;;  %v1025_v32 = vld [vmem:[%s2341_s8 + $0x50] sm:$0xff]  ;;  %v1028_v58 = vld [vmem:[%s2341_s8 + $0x68] sm:$0xff]  ;;  %v1049_v62 = vld [vmem:[%s2342_s9] sm:$0x3] }
 0x2e4   :  { %v1475_v22 = vpop.eup %1474  ;;  %1494 = vpow2.f32 %v724_v6 }
 0x2e5   :  { %v1477_v48 = vpop.eup %1476  ;;  %1309 = vmatprep.subr.bf16.mxu1 %v1308_v19  ;;  %v1394_v19 = vpack.c.bf16 %v1025_v32, %v1023_v38 }
 0x2e6   :  { %v1479_v55 = vpop.eup %1478  ;;  %1311 = vmatpush1.bf16.msra.mxu1 %v1310_v39  ;;  %v1314_v28 = vpack.c.bf16 %v1477_v48, %v1473_v40  ;;  %v1030_v40 = vld [vmem:[%s2341_s8 + $0x78] sm:$0xff]  ;;  %v1027_v39 = vld [vmem:[%s2341_s8 + $0x60] sm:$0xff]  ;;  %v1029_v48 = vld [vmem:[%s2341_s8 + $0x70] sm:$0xff] }
 0x2e7   :  { %v1481_v51 = vpop.eup %1480  ;;  %v1312_v52 = vpack.c.bf16 %v1479_v55, %v1475_v22  ;;  %v1396_v22 = vpack.c.bf16 %v1030_v40, %v1028_v58 }
 0x2e8   :  { %v1483_v56 = vpop.eup %1482 }
 0x2e9   :  { %v1485_v1 = vpop.eup %1484  ;;  %1313 = vmatprep.subr.bf16.mxu1 %v1312_v52  ;;  %v1034_v52 = vld [vmem:[%s2341_s8 + $0x98] sm:$0xff] }
 0x2ea   :  { %v1487_v42 = vpop.eup %1486  ;;  %1315 = vmatpush1.bf16.msra.mxu1 %v1314_v28  ;;  %v1318_v36 = vpack.c.bf16 %v1485_v1, %v1481_v51  ;;  %v1032_v51 = vld [vmem:[%s2341_s8 + $0x88] sm:$0xff]  ;;  %v1031_v1 = vld [vmem:[%s2341_s8 + $0x80] sm:$0xff] }
 0x2eb   :  { %v1489_v26 = vpop.eup %1488  ;;  %v1316_v27 = vpack.c.bf16 %v1487_v42, %v1483_v56  ;;  %v1398_v56 = vpack.c.bf16 %v1029_v48, %v1027_v39  ;;  %v1400_v28 = vpack.c.bf16 %v1034_v52, %v1032_v51  ;;  %v1033_v42 = vld [vmem:[%s2341_s8 + $0x90] sm:$0xff] }
 0x2ec   :  { %v1491_v63 = vpop.eup %1490 }
 0x2ed   :  { %v1493_v47 = vpop.eup %1492  ;;  %1317 = vmatprep.subr.bf16.mxu1 %v1316_v27  ;;  %v1038_v27 = vld [vmem:[%s2341_s8 + $0xb8] sm:$0xff] }
 0x2ee   :  { %v1495_v12 = vpop.eup %1494  ;;  %1319 = vmatpush1.bf16.msra.mxu1 %v1318_v36  ;;  %v1322_v46 = vpack.c.bf16 %v1493_v47, %v1489_v26  ;;  %v1036_v26 = vld [vmem:[%s2341_s8 + $0xa8] sm:$0xff]  ;;  %v1035_v47 = vld [vmem:[%s2341_s8 + $0xa0] sm:$0xff] }
 0x2ef   :  { %v1320_v37 = vpack.c.bf16 %v1495_v12, %v1491_v63  ;;  %v1402_v63 = vpack.c.bf16 %v1033_v42, %v1031_v1  ;;  %v1404_v36 = vpack.c.bf16 %v1038_v27, %v1036_v26  ;;  %v1037_v12 = vld [vmem:[%s2341_s8 + $0xb0] sm:$0xff] }
 0x2f1   :  { %1321 = vmatprep.subr.bf16.mxu1 %v1320_v37  ;;  %v1040_v37 = vld [vmem:[%s2341_s8 + $0xc8] sm:$0xff] }
 0x2f2   :  { %1323 = vmatpush1.bf16.msra.mxu1 %v1322_v46  ;;  %v1042_v46 = vld [vmem:[%s2341_s8 + $0xd8] sm:$0xff] }
 0x2f3   :  { %1360 = vmatprep.subr.bf16.mxu1 %v1498_v0 }
 0x2f5   :  { %792 = vmatmul.mubr.f32.vlgmr.msra.gmra.mrb[32].mxu1 %v726_v9  ;;  %v1406_v9 = vpack.c.bf16 %v1037_v12, %v1035_v47 }
 0x2f6   :  { %1362 = vmatpush3.bf16.msra.mxu1 %v1814_v41  ;;  %v2356_v41 = vld [vmem:[#allocation4_spill] sm:$0xff]  ;;  %1237 = vmatprep.mubr.msk.f32.mxu1 %vm1500_vm1, %v2358_v45  ;;  %v1043_v45 = vld [vmem:[%s2341_s8 + $0xe0] sm:$0xff] }
 0x2f7   :  { %1363 = vmatprep.subr.bf16.mxu1 %v1498_v0 }
 0x2fa   :  { %1365 = vmatpush3.bf16.msra.mxu1 %v1822_v50  ;;  %v2357_v50 = vld [vmem:[#allocation5_spill] sm:$0xff] }
 0x2fb   :  { %1366 = vmatprep.subr.bf16.mxu1 %v1498_v0 }
 0x2fe   :  { %1368 = vmatpush3.bf16.msra.mxu1 %v1830_v59  ;;  %v820_v59 = vld [vmem:[%s2338_s7 + $0xb0] sm:$0xff] }
 0x2ff   :  { %1369 = vmatprep.subr.bf16.mxu1 %v1498_v0 }
 0x302   :  { %1371 = vmatpush3.bf16.msra.mxu1 %v1838_v5  ;;  %v821_v5 = vld [vmem:[%s2338_s7 + $0xb8] sm:$0xff]  ;;  %s1501_s7 = smov 24  }
 0x303   :  { %1372 = vmatprep.subr.bf16.mxu1 %v1498_v0  ;;  %v1358_v21 = vpack.c.bf16 %v821_v5, %v820_v59  ;;  %v1046_v59 = vld [vmem:[%s2341_s8 + $0xf8] sm:$0xff] }
 0x305   :  { %1359 = vmatpush1.bf16.msra.mxu0 %v1358_v21 }
 0x306   :  { %1374 = vmatpush3.bf16.msra.mxu1 %v2354_v54  ;;  %1385 = vmatprep.subr.bf16.mxu0 %v1384_v31  ;;  %v1408_v54 = vpack.c.bf16 %v1042_v46, %v1040_v37 }
 0x307   :  { %1375 = vmatprep.subr.bf16.mxu1 %v1498_v0 }
 0x30a   :  { %1377 = vmatpush3.bf16.msra.mxu1 %v2355_v30  ;;  %v1039_v30 = vld [vmem:[%s2341_s8 + $0xc0] sm:$0xff] }
 0x30b   :  { %1378 = vmatprep.subr.bf16.mxu1 %v1498_v0 }
 0x30e   :  { %1380 = vmatpush3.bf16.msra.mxu1 %v2356_v41  ;;  %v1041_v41 = vld [vmem:[%s2341_s8 + $0xd0] sm:$0xff] }
 0x30f   :  { %1381 = vmatprep.subr.bf16.mxu1 %v1498_v0  ;;  %v1410_v5 = vpack.c.bf16 %v1041_v41, %v1039_v30 }
 0x312   :  { %1383 = vmatpush3.bf16.msra.mxu1 %v2357_v50  ;;  %v1044_v50 = vld [vmem:[%s2341_s8 + $0xe8] sm:$0xff] }
 0x313   :  { %v1412_v21 = vpack.c.bf16 %v1046_v59, %v1044_v50 }
 0x315   :  { %1238 = vmatmul.mubr.f32.vlgmr.msra.gmra.mrb[34].mxu1 %v895_v53  ;;  %v1045_v53 = vld [vmem:[%s2341_s8 + $0xf0] sm:$0xff] }
 0x3c8   :  { %v793_v0 = vpop.f32.mrb[32].mxu1 }
 0x3c9   :  { %v795_v20 = vpop.f32.mrb[33].mxu1 }
 0x3ca   :  { %1185 = vmatprep.mubr.msk.f32.mxu0 %vm98_vm0, %v795_v20  ;;  %v1048_v20 = vld [vmem:[%s2341_s8 + $0x108] sm:$0xff] }
 0x3cb   :  { %890 = vmatmul.mubr.f32.vlgmr.msra.gmra.mrb[32].mxu0 %v793_v0  ;;  %v1414_v0 = vpack.c.bf16 %v1045_v53, %v1043_v45 }
 0x3cc   :  { %1387 = vmatpush1.bf16.msra.mxu0 %v1386_v17 }
 0x3cd   :  { %1389 = vmatprep.subr.bf16.mxu0 %v1388_v2 }
 0x3d0   :  { %1391 = vmatpush1.bf16.msra.mxu0 %v1390_v33 }
 0x3d1   :  { %1393 = vmatprep.subr.bf16.mxu0 %v1392_v16 }
 0x3d4   :  { %1395 = vmatpush1.bf16.msra.mxu0 %v1394_v19 }
 0x3d5   :  { %1397 = vmatprep.subr.bf16.mxu0 %v1396_v22 }
 0x3d8   :  { %1399 = vmatpush1.bf16.msra.mxu0 %v1398_v56 }
 0x3d9   :  { %1401 = vmatprep.subr.bf16.mxu0 %v1400_v28 }
 0x3dc   :  { %1403 = vmatpush1.bf16.msra.mxu0 %v1402_v63 }
 0x3dd   :  { %1405 = vmatprep.subr.bf16.mxu0 %v1404_v36 }
 0x3e0   :  { %1407 = vmatpush1.bf16.msra.mxu0 %v1406_v9 }
 0x3e1   :  { %1409 = vmatprep.subr.bf16.mxu0 %v1408_v54 }
 0x3e4   :  { %1411 = vmatpush1.bf16.msra.mxu0 %v1410_v5 }
 0x3e5   :  { %1413 = vmatprep.subr.bf16.mxu0 %v1412_v21 }
 0x3e8   :  { %v2209_v35 = vpop.f32.mrb[34].mxu1  ;;  %1415 = vmatpush1.bf16.msra.mxu0 %v1414_v0 }
 0x3e9   :  { %v1239_v57 = vpop.f32.mrb[35].mxu1  ;;  %1097 = vmatprep.subr.mxu0 %v1048_v20 }
 0x49e   :  { %v2206_v61 = vpop.f32.mrb[32].mxu0 }
 0x49f   :  { %1496 = vrcp.f32 %v2206_v61  ;;  %v893_v34 = vpop.f32.mrb[33].mxu0 }
 0x4a0   :  { %v1047_v34 = vld [vmem:[%s2341_s8 + $0x100] sm:$0xff] }
 0x4a1   :  { %1098 = vmatpush1.msra.mxu0 %v1047_v34 }
 0x4a9   :  { %v1497_v43 = vpop.eup %1496 }
 0x4aa   :  { %v968_v60 = vrot.slane %v1497_v43, 7  ;;  %v971_v4 = vrot.slane %v1497_v43, 6  ;;  %974 = vrot.lane.b32.xlu0 %v1497_v43, %s1501_s7 }
 0x4ac   :  { %v970_v18 = vmul.f32 %v968_v60, %v2206_v61  ;;  %v973_v13 = vmul.f32 %v971_v4, %v2206_v61 }
 0x4ae   :  { %v979_v24 = vrot.slane %v970_v18, 1  ;;  %v997_v49 = vrot.slane %v970_v18, 3  ;;  %v984_v7 = vrot.slane %v973_v13, 2  ;;  %v1001_v15 = vrot.slane %v973_v13, 4 }
 0x4b0   :  { %v1422_v6 = vpack.i.bf16 %v997_v49, %v979_v24  ;;  %v1427_v55 = vpack.i.bf16 %v1001_v15, %v984_v7  ;;  %v2359_v24 = vld [vmem:[#allocation6_spill] sm:$0xff] }
 0x4b1   :  { %v2360_v49 = vsub.s32 0, %v2359_v24  ;;  %v2361_v16 = vsub.s32 1, %v2359_v24 }
 0x4b2   :  { %1423 = vrot.lane.b32.xlu1 %v1422_v6, %s1502_s14 }
 0x4b3   :  { %v1054_v33 = vrot.slane %v1049_v62, %v2360_v49 }
 0x4b6   :  { %1428 = vrot.lane.b32.xlu1 %v1427_v55, %s1503_s22 }
 0x51c   :  { %v975_v43 = vpop.permute.xlu0 %974 }
 0x51d   :  { %v977_v60 = vmul.f32 %v975_v43, %v2206_v61 }
 0x51f   :  { %v1005_v4 = vrot.slane %v977_v60, 2  ;;  %989 = vrot.lane.b32.xlu1 %v977_v60, %s1503_s22 }
 0x521   :  { %1006 = vrot.lane.b32.xlu0 %v1005_v4, %s1503_s22 }
 0x524   :  { %v1424_v3 = vpop.permute.xlu1 %1423 }
 0x525   :  { %v1426_v11 = vunpack.i.h.bf16 %v1424_v3  ;;  %v1425_v57 = vunpack.i.l.bf16 %v1424_v3 }
 0x527   :  { %v992_v44 = vsel %vm98_vm0, %v2209_v35, %v1425_v57  ;;  %v1009_v61 = vsel %vm98_vm0, %v2209_v35, %v1426_v11  ;;  %v1058_v35 = vrot.slane %v1049_v62, %v2361_v16 }
 0x528   :  { %v1429_v29 = vpop.permute.xlu1 %1428 }
 0x529   :  { %v1431_v31 = vunpack.i.h.bf16 %v1429_v29  ;;  %v1430_v8 = vunpack.i.l.bf16 %v1429_v29 }
 0x52b   :  { %v994_v18 = vsel %vm993_vm2, %v992_v44, %v1430_v8  ;;  %v1010_v17 = vsel %vm993_vm2, %v1009_v61, %v1431_v31 }
 0x591   :  { %v990_v10 = vpop.permute.xlu1 %989 }
 0x592   :  { %v996_v2 = vsel %vm995_vm3, %v994_v18, %v990_v10 }
 0x593   :  { %v1007_v13 = vpop.permute.xlu0 %1006 }
 0x594   :  { %v1011_v14 = vsel %vm995_vm3, %v1010_v17, %v1007_v13  ;;  %v1014_v25 = vsel %vm1012_vm4, %v990_v10, %v1007_v13 }
 0x595   :  { %1186 = vmatprep.mubr.msk.f32.mxu0 %vm1061_vm5, %v1014_v25  ;;  %v1013_v23 = vsel %vm1012_vm4, %v996_v2, %v1011_v14 }
 0x596   :  { %1130 = vmatmul.mubr.f32.vlgmr.msra.gmra.mrb[34].mxu0 %v1013_v23 }
 0x669   :  { %v1131_v38 = vpop.f32.mrb[34].mxu0 }
 0x66a   :  { %v1132_v32 = vadd.f32 %v1131_v38, %v1054_v33  ;;  %v1133_v6 = vpop.f32.mrb[35].mxu0 }
 0x66b   :  { %v1134_v7 = vadd.f32 %v1133_v6, %v1058_v35 }
 0x66d   :  { %v1138_v15 = vcombine.low %v1132_v32, %v1134_v7 }
 0x66f   :  { %1187 = vst.sshfl [vmem:[%s2343_s10] sm:$0x33 pattern:$0x76325410] %v1138_v15 }

// kernel: model_forward.4
= control target key start
LH: loop header
LB: loop body
LE: loop exit
PB: predicated region body
PF: predicated region fallthrough
CT: control target
= control target key end

     0   :  { %vm75_vm0 = vcmask 138240   ;;  %vm78_vm1 = vcmask 1040384   ;;  %v55_v58 = vlaneseq  ;;  %v216_v63 = vmov 1983009808   ;;  %s360_s1 = inlined_call_operand.vmem [shape: f32[145,240], index: 1, kind: input, shape index: {}]   ;;  %s361_s0 = inlined_call_operand.vmem [shape: f32[2,145], index: 0, kind: input, shape index: {}]   ;;  %s362_s2 = inlined_call_operand.vmem [shape: f32[1,240], index: 2, kind: input, shape index: {}]   ;;  %s363_s3 = inlined_call_operand.vmem [shape: f32[2,240], index: 3, kind: output, shape index: {}]  }
   0x1   :  { %v16_v0 = vld [vmem:[%s360_s1 + $0x8] sm:$0xff]  ;;  %v18_v1 = vld [vmem:[%s360_s1 + $0x18] sm:$0xff]  ;;  %v15_v2 = vld [vmem:[%s360_s1] sm:$0xff]  ;;  %vm167_vm2 = vcmask 1041408   ;;  %vm168_vm3 = vcmask 912386  }
   0x2   :  { %v179_v3 = vpack.c.bf16 %v18_v1, %v16_v0  ;;  %v17_v4 = vld [vmem:[%s360_s1 + $0x10] sm:$0xff]  ;;  %v20_v5 = vld [vmem:[%s360_s1 + $0x28] sm:$0xff]  ;;  %v22_v6 = vld [vmem:[%s360_s1 + $0x38] sm:$0xff]  ;;  %v56_v59 = vshrl.u32 %v55_v58, 7  ;;  %v160_v0 = vunpack.c.l.s4 %v216_v63 }
   0x3   :  { %v181_v7 = vpack.c.bf16 %v17_v4, %v15_v2  ;;  %v183_v8 = vpack.c.bf16 %v22_v6, %v20_v5  ;;  %v19_v9 = vld [vmem:[%s360_s1 + $0x20] sm:$0xff]  ;;  %v21_v10 = vld [vmem:[%s360_s1 + $0x30] sm:$0xff]  ;;  %v24_v11 = vld [vmem:[%s360_s1 + $0x48] sm:$0xff] }
   0x4   :  { %180 = vmatprep.subr.bf16.mxu0 %v179_v3  ;;  %v26_v12 = vld [vmem:[%s360_s1 + $0x58] sm:$0xff]  ;;  %v185_v13 = vpack.c.bf16 %v21_v10, %v19_v9  ;;  %v23_v15 = vld [vmem:[%s360_s1 + $0x40] sm:$0xff]  ;;  %v25_v16 = vld [vmem:[%s360_s1 + $0x50] sm:$0xff]  ;;  %v57_v60 = vsub.s32 0, %v56_v59  ;;  %v61_v62 = vsub.s32 1, %v56_v59  ;;  %v161_v3 = vunpack.c.0.s8 %v160_v0 }
   0x5   :  { %182 = vmatpush1.bf16.msra.mxu0 %v181_v7  ;;  %v187_v14 = vpack.c.bf16 %v26_v12, %v24_v11  ;;  %v28_v17 = vld [vmem:[%s360_s1 + $0x68] sm:$0xff]  ;;  %v30_v18 = vld [vmem:[%s360_s1 + $0x78] sm:$0xff]  ;;  %v189_v19 = vpack.c.bf16 %v25_v16, %v23_v15  ;;  %v27_v21 = vld [vmem:[%s360_s1 + $0x60] sm:$0xff] }
   0x6   :  { %184 = vmatprep.subr.bf16.mxu0 %v183_v8  ;;  %v191_v20 = vpack.c.bf16 %v30_v18, %v28_v17  ;;  %v29_v22 = vld [vmem:[%s360_s1 + $0x70] sm:$0xff]  ;;  %v32_v23 = vld [vmem:[%s360_s1 + $0x88] sm:$0xff]  ;;  %v34_v24 = vld [vmem:[%s360_s1 + $0x98] sm:$0xff]  ;;  %v164_v8 = vsub.s32 %v161_v3, %v56_v59 }
   0x7   :  { %v193_v25 = vpack.c.bf16 %v29_v22, %v27_v21  ;;  %v195_v26 = vpack.c.bf16 %v34_v24, %v32_v23  ;;  %v31_v27 = vld [vmem:[%s360_s1 + $0x80] sm:$0xff]  ;;  %v33_v28 = vld [vmem:[%s360_s1 + $0x90] sm:$0xff]  ;;  %v36_v30 = vld [vmem:[%s360_s1 + $0xa8] sm:$0xff] }
   0x8   :  { %v175_v29 = vld.sshfl [vmem:[%s361_s0] sm:$0x33 pattern:$0x76325410]  ;;  %v38_v31 = vld [vmem:[%s360_s1 + $0xb8] sm:$0xff]  ;;  %v197_v33 = vpack.c.bf16 %v33_v28, %v31_v27  ;;  %v37_v36 = vld [vmem:[%s360_s1 + $0xb0] sm:$0xff] }
   0x9   :  { %186 = vmatpush1.bf16.msra.mxu0 %v185_v13  ;;  %v73_v32 = vcombine.high %v175_v29, %v175_v29  ;;  %v199_v34 = vpack.c.bf16 %v38_v31, %v36_v30  ;;  %v35_v35 = vld [vmem:[%s360_s1 + $0xa0] sm:$0xff]  ;;  %v40_v37 = vld [vmem:[%s360_s1 + $0xc8] sm:$0xff]  ;;  %v42_v38 = vld [vmem:[%s360_s1 + $0xd8] sm:$0xff] }
   0xa   :  { %188 = vmatprep.subr.bf16.mxu0 %v187_v14  ;;  %v201_v39 = vpack.c.bf16 %v37_v36, %v35_v35  ;;  %v203_v40 = vpack.c.bf16 %v42_v38, %v40_v37  ;;  %v39_v41 = vld [vmem:[%s360_s1 + $0xc0] sm:$0xff]  ;;  %v41_v42 = vld [vmem:[%s360_s1 + $0xd0] sm:$0xff]  ;;  %v44_v43 = vld [vmem:[%s360_s1 + $0xe8] sm:$0xff] }
   0xb   :  { %178 = vmatprep.mubr.msk.f32.mxu0 %vm75_vm0, %v73_v32  ;;  %v46_v44 = vld [vmem:[%s360_s1 + $0xf8] sm:$0xff]  ;;  %v205_v45 = vpack.c.bf16 %v41_v42, %v39_v41  ;;  %v43_v47 = vld [vmem:[%s360_s1 + $0xe0] sm:$0xff]  ;;  %v45_v48 = vld [vmem:[%s360_s1 + $0xf0] sm:$0xff] }
   0xc   :  { %v207_v46 = vpack.c.bf16 %v46_v44, %v44_v43  ;;  %v48_v49 = vld [vmem:[%s360_s1 + $0x108] sm:$0xff]  ;;  %v50_v50 = vld [vmem:[%s360_s1 + $0x118] sm:$0xff]  ;;  %v209_v51 = vpack.c.bf16 %v45_v48, %v43_v47  ;;  %v47_v53 = vld [vmem:[%s360_s1 + $0x100] sm:$0xff] }
   0xd   :  { %190 = vmatpush1.bf16.msra.mxu0 %v189_v19  ;;  %v211_v52 = vpack.c.bf16 %v50_v50, %v48_v49  ;;  %v49_v54 = vld [vmem:[%s360_s1 + $0x110] sm:$0xff]  ;;  %v52_v56 = vld [vmem:[%s360_s1 + $0x128] sm:$0x1]  ;;  %v51_v57 = vld [vmem:[%s360_s1 + $0x120] sm:$0x1] }
   0xe   :  { %192 = vmatprep.subr.bf16.mxu0 %v191_v20  ;;  %v213_v55 = vpack.c.bf16 %v49_v54, %v47_v53  ;;  %v53_v61 = vld [vmem:[%s362_s2] sm:$0x3]  ;;  %vm169_vm4 = vmor %vm168_vm3, %vm167_vm2 }
   0xf   :  { %v58_v1 = vrot.slane %v53_v61, %v57_v60  ;;  %v62_v2 = vrot.slane %v53_v61, %v61_v62 }
  0x11   :  { %194 = vmatpush1.bf16.msra.mxu0 %v193_v25 }
  0x12   :  { %196 = vmatprep.subr.bf16.mxu0 %v195_v26 }
  0x15   :  { %198 = vmatpush1.bf16.msra.mxu0 %v197_v33 }
  0x16   :  { %200 = vmatprep.subr.bf16.mxu0 %v199_v34 }
  0x19   :  { %202 = vmatpush1.bf16.msra.mxu0 %v201_v39 }
  0x1a   :  { %204 = vmatprep.subr.bf16.mxu0 %v203_v40 }
  0x1d   :  { %206 = vmatpush1.bf16.msra.mxu0 %v205_v45 }
  0x1e   :  { %208 = vmatprep.subr.bf16.mxu0 %v207_v46 }
  0x21   :  { %210 = vmatpush1.bf16.msra.mxu0 %v209_v51 }
  0x22   :  { %212 = vmatprep.subr.bf16.mxu0 %v211_v52 }
  0x25   :  { %214 = vmatpush1.bf16.msra.mxu0 %v213_v55 }
  0x26   :  { %176 = vmatprep.subr.msk.mxu0 %vm78_vm1, %v52_v56 }
  0x29   :  { %177 = vmatpush1.msk.msra.mxu0 %vm78_vm1, %v51_v57 }
  0x2a   :  { %150 = vmatmul.mubr.f32.vlgmr.msra.gmra.mrb[0].mxu0 %v175_v29 }
  0xfd   :  { %v151_v4 = vpop.f32.mrb[0].mxu0 }
  0xfe   :  { %v152_v5 = vadd.f32 %v151_v4, %v58_v1  ;;  %v153_v6 = vpop.f32.mrb[1].mxu0 }
  0xff   :  { %v154_v7 = vadd.f32 %v153_v6, %v62_v2 }
 0x101   :  { %v158_v9 = vcombine.low %v152_v5, %v154_v7 }
 0x103   :  { %v165_v10 = vrot.slane %v158_v9, %v164_v8 }
 0x105   :  { %170 = vst.msk [vmem:[%s363_s3] sm:$0xf] %vm169_vm4, %v165_v10 }

// kernel: model_forward.5
= control target key start
LH: loop header
LB: loop body
LE: loop exit
PB: predicated region body
PF: predicated region fallthrough
CT: control target
= control target key end

     0   :  { %v46_v0 = vlaneseq  ;;  %v311_v1 = vmov 0.0|0.0   ;;  %v312_v5 = vmov 1983009808   ;;  %v313_v10 = vmov 2   ;;  %s318_s17 = smov 86   ;;  %s319_s18 = smov 107   ;;  %s469_s2 = inlined_call_operand.vmem [shape: f32[192,63], index: 2, kind: input, shape index: {}]   ;;  %s470_s0 = inlined_call_operand.vmem [shape: f32[2,192], index: 0, kind: input, shape index: {}]   ;;  %s471_s1 = inlined_call_operand.vmem [shape: f32[2,3], index: 1, kind: input, shape index: {}]   ;;  %s472_s5 = inlined_call_operand.vmem [shape: f32[2,192], index: 5, kind: output, shape index: {2}]   ;;  %s473_s4 = inlined_call_operand.vmem [shape: f32[2,63], index: 4, kind: output, shape index: {1}]   ;;  %s474_s3 = inlined_call_operand.vmem [shape: f32[2,42], index: 3, kind: output, shape index: {0}]  }
   0x1   :  { %254 = vmatprep.subr.bf16.mxu0 %v311_v1  ;;  %v18_v2 = vld [vmem:[%s469_s2] sm:$0xff]  ;;  %v19_v3 = vld [vmem:[%s469_s2 + $0x8] sm:$0xff]  ;;  %v20_v4 = vld [vmem:[%s469_s2 + $0x10] sm:$0xff]  ;;  %v44_v6 = vunpack.c.l.s4 %v312_v5  ;;  %303 = vset.pattern.permute.xlu0 %v313_v10  ;;  %v314_v11 = vmov 1   ;;  %vm52_vm0 = vcmask 523264   ;;  %v315_v27 = vmov 0  }
   0x2   :  { %v255_v7 = vpack.c.bf16 %v19_v3, %v18_v2  ;;  %v21_v8 = vld [vmem:[%s469_s2 + $0x18] sm:$0xff]  ;;  %v47_v9 = vshrl.u32 %v46_v0, 7  ;;  %305 = vset.pattern.permute.xlu1 %v314_v11  ;;  %v22_v14 = vld [vmem:[%s469_s2 + $0x20] sm:$0xff]  ;;  %v23_v15 = vld [vmem:[%s469_s2 + $0x28] sm:$0xff]  ;;  %v316_v31 = vmov 42   ;;  %v183_v51 = vand.u32 127, %v46_v0 }
   0x3   :  { %v45_v12 = vunpack.c.0.s8 %v44_v6  ;;  %v258_v13 = vpack.c.bf16 %v21_v8, %v20_v4  ;;  %v261_v17 = vpack.c.bf16 %v23_v15, %v22_v14  ;;  %v24_v18 = vld [vmem:[%s469_s2 + $0x30] sm:$0xff]  ;;  %v25_v19 = vld [vmem:[%s469_s2 + $0x38] sm:$0xff]  ;;  %v383_v20 = vld [vmem:[%s470_s0] sm:$0xf]  ;;  %vm237_vm11 = vcmask 1041408  }
   0x4   :  { %256 = vmatpush1.bf16.msra.mxu0 %v255_v7  ;;  %v125_v21 = vld [vmem:[%s471_s1] sm:$0x3]  ;;  %v264_v23 = vpack.c.bf16 %v25_v19, %v24_v18  ;;  %v27_v26 = vld [vmem:[%s469_s2 + $0x48] sm:$0xff]  ;;  %v28_v29 = vld [vmem:[%s469_s2 + $0x50] sm:$0xff]  ;;  %v184_v52 = vadd.s32 128, %v183_v51  ;;  %vm238_vm12 = vcmask 519170  }
   0x5   :  { %257 = vmatprep.subr.bf16.mxu0 %v311_v1  ;;  %v371_v16 = vsub.s32 %v45_v12, %v47_v9  ;;  %128 = vperm.xlu0 %303, %v125_v21   ;;  %v26_v25 = vld [vmem:[%s469_s2 + $0x40] sm:$0xff]  ;;  %v29_v30 = vld [vmem:[%s469_s2 + $0x58] sm:$0xff]  ;;  %v31_v34 = vld [vmem:[%s469_s2 + $0x68] sm:$0xff]  ;;  %v448_v53 = vmul.u32.u64.low 2863311531, %v183_v51  ;;  %v449_v54 = vmul.u32.u64.high 2863311531, %v183_v51, %v448_v53  ;;  %v317_v18 = vmov 21  }
   0x6   :  { %147 = vperm.xlu1 %305, %v125_v21   ;;  %v267_v28 = vpack.c.bf16 %v27_v26, %v26_v25  ;;  %v270_v32 = vpack.c.bf16 %v29_v30, %v28_v29  ;;  %v30_v33 = vld [vmem:[%s469_s2 + $0x60] sm:$0xff]  ;;  %v32_v36 = vld [vmem:[%s469_s2 + $0x70] sm:$0xff]  ;;  %v33_v37 = vld [vmem:[%s469_s2 + $0x78] sm:$0xff]  ;;  %v451_v55 = vmul.u32.u64.low 2863311531, %v184_v52  ;;  %v452_v56 = vmul.u32.u64.high 2863311531, %v184_v52, %v451_v55 }
   0x7   :  { %v49_v22 = vrot.slane %v383_v20, %v371_v16  ;;  %v273_v35 = vpack.c.bf16 %v31_v34, %v30_v33  ;;  %v276_v38 = vpack.c.bf16 %v33_v37, %v32_v36  ;;  %v34_v39 = vld [vmem:[%s469_s2 + $0x80] sm:$0xff]  ;;  %v35_v40 = vld [vmem:[%s469_s2 + $0x88] sm:$0xff]  ;;  %v36_v42 = vld [vmem:[%s469_s2 + $0x90] sm:$0xff]  ;;  %v191_v57 = vshrl.u32 %v449_v54, 1 }
   0x8   :  { %259 = vmatpush1.bf16.msra.mxu0 %v258_v13  ;;  %v279_v41 = vpack.c.bf16 %v35_v40, %v34_v39  ;;  %v37_v43 = vld [vmem:[%s469_s2 + $0x98] sm:$0xff]  ;;  %v38_v45 = vld [vmem:[%s469_s2 + $0xa0] sm:$0xff]  ;;  %v39_v46 = vld [vmem:[%s469_s2 + $0xa8] sm:$0xff]  ;;  %v202_v58 = vshrl.u32 %v452_v56, 1  ;;  %vm157_vm14 = vcmask 171008   ;;  %vm178_vm15 = vcmask 343040  }
   0x9   :  { %260 = vmatprep.subr.bf16.mxu0 %v311_v1  ;;  %v50_v24 = vcombine.high %v49_v22, %v49_v22  ;;  %304 = vset.pattern.permute.xlu0 %v315_v27  ;;  %v282_v44 = vpack.c.bf16 %v37_v43, %v36_v42  ;;  %v285_v47 = vpack.c.bf16 %v39_v46, %v38_v45  ;;  %v40_v48 = vld [vmem:[%s469_s2 + $0xb0] sm:$0xff]  ;;  %v41_v49 = vld [vmem:[%s469_s2 + $0xb8] sm:$0xff]  ;;  %v192_v59 = vmul.u32 3, %v191_v57  ;;  %vm239_vm13 = vmor %vm238_vm12, %vm237_vm11 }
   0xa   :  { %135 = vperm.xlu0 %304, %v125_v21   ;;  %306 = vset.pattern.permute.xlu1 %v315_v27  ;;  %v288_v50 = vpack.c.bf16 %v41_v49, %v40_v48  ;;  %v203_v60 = vmul.u32 3, %v202_v58 }
   0xb   :  { %253 = vmatprep.mubr.msk.f32.mxu0 %vm52_vm0, %v50_v24  ;;  %v193_v61 = vsub.s32 %v183_v51, %v192_v59  ;;  %vm180_vm0 = vcmask 508928  }
   0xc   :  { %262 = vmatpush1.bf16.msra.mxu0 %v261_v17  ;;  %v204_v62 = vsub.s32 %v184_v52, %v203_v60 }
   0xd   :  { %263 = vmatprep.subr.bf16.mxu0 %v311_v1  ;;  %vm207_vm1 = vcmp.ne.s32.totalorder %v193_v61, 0  ;;  %vm209_vm2 = vcmp.lt.s32.totalorder %v193_v61, 0  ;;  %v213_v63 = vadd.s32 3, %v193_v61 }
   0xe   :  { %308 = vset.pattern.permute.xlu0 %v316_v31  ;;  %vm208_vm3 = vcmp.ne.s32.totalorder %v204_v62, 0  ;;  %vm210_vm4 = vcmp.lt.s32.totalorder %v204_v62, 0  ;;  %vm211_vm5 = vmand %vm209_vm2, %vm207_vm1  ;;  %v214_v0 = vadd.s32 3, %v204_v62  ;;  %vm159_vm1 = vcmask 336896  }
   0xf   :  { %vm212_vm6 = vmand %vm210_vm4, %vm208_vm3 }
  0x10   :  { %265 = vmatpush1.bf16.msra.mxu0 %v264_v23  ;;  %v216_v2 = vsel %vm212_vm6, %v214_v0, %v204_v62 }
  0x11   :  { %266 = vmatprep.subr.bf16.mxu0 %v311_v1  ;;  %vm220_vm8 = vcmp.eq.s32.totalorder %v216_v2, 1  ;;  %vm218_vm10 = vcmp.eq.s32.totalorder %v216_v2, 0 }
  0x14   :  { %268 = vmatpush1.bf16.msra.mxu0 %v267_v28 }
  0x15   :  { %269 = vmatprep.subr.bf16.mxu0 %v311_v1 }
  0x18   :  { %271 = vmatpush1.bf16.msra.mxu0 %v270_v32 }
  0x19   :  { %272 = vmatprep.subr.bf16.mxu0 %v311_v1 }
  0x1c   :  { %274 = vmatpush1.bf16.msra.mxu0 %v273_v35 }
  0x1d   :  { %275 = vmatprep.subr.bf16.mxu0 %v311_v1 }
  0x20   :  { %277 = vmatpush1.bf16.msra.mxu0 %v276_v38 }
  0x21   :  { %278 = vmatprep.subr.bf16.mxu0 %v311_v1 }
  0x24   :  { %280 = vmatpush1.bf16.msra.mxu0 %v279_v41 }
  0x25   :  { %281 = vmatprep.subr.bf16.mxu0 %v311_v1 }
  0x28   :  { %283 = vmatpush1.bf16.msra.mxu0 %v282_v44 }
  0x29   :  { %284 = vmatprep.subr.bf16.mxu0 %v311_v1 }
  0x2c   :  { %286 = vmatpush1.bf16.msra.mxu0 %v285_v47 }
  0x2d   :  { %287 = vmatprep.subr.bf16.mxu0 %v311_v1  ;;  %v215_v1 = vsel %vm211_vm5, %v213_v63, %v193_v61 }
  0x2e   :  { %vm219_vm7 = vcmp.eq.s32.totalorder %v215_v1, 1  ;;  %vm217_vm9 = vcmp.eq.s32.totalorder %v215_v1, 0 }
  0x30   :  { %289 = vmatpush1.bf16.msra.mxu0 %v288_v50 }
  0x33   :  { %120 = vmatmul.mubr.f32.vlgmr.msra.gmra.mrb[0].mxu0 %v49_v22 }
  0x84   :  { %v129_v3 = vpop.permute.xlu0 %128 }
  0x85   :  { %v148_v4 = vpop.permute.xlu1 %147 }
  0x86   :  { %v221_v5 = vsel %vm219_vm7, %v148_v4, %v129_v3  ;;  %v222_v6 = vsel %vm220_vm8, %v148_v4, %v129_v3 }
  0x89   :  { %v136_v7 = vpop.permute.xlu0 %135 }
  0x8a   :  { %v223_v8 = vsel %vm217_vm9, %v136_v7, %v221_v5  ;;  %v224_v9 = vsel %vm218_vm10, %v136_v7, %v222_v6 }
  0x8b   :  { %v227_v10 = vcombine.low %v223_v8, %v224_v9 }
  0x8d   :  { %v234_v11 = vrot.slane %v227_v10, %v371_v16 }
  0x8f   :  { %v236_v12 = vadd.f32 %v234_v11, %v383_v20 }
  0x91   :  { %240 = vst.msk [vmem:[%s472_s5] sm:$0xf] %vm239_vm13, %v236_v12 }
 0x106   :  { %v121_v13 = vpop.f32.mrb[0].mxu0 }
 0x107   :  { %v131_v14 = vadd.f32 %v129_v3, %v121_v13  ;;  %173 = vperm.xlu0 %308, %v121_v13   ;;  %163 = vperm.xlu1 %306, %v121_v13   ;;  %v123_v15 = vpop.f32.mrb[1].mxu0  ;;  %v138_v26 = vadd.f32 %v136_v7, %v121_v13  ;;  %v150_v30 = vadd.f32 %v148_v4, %v121_v13 }
 0x109   :  { %v132_v17 = vadd.f32 0.0001, %v131_v14 }
 0x10b   :  { %307 = vset.pattern.permute.xlu1 %v317_v18  ;;  %309 = vrcp.f32 %v132_v17 }
 0x10c   :  { %168 = vperm.xlu1 %307, %v121_v13  }
 0x115   :  { %v310_v19 = vpop.eup %309 }
 0x116   :  { %140 = vrot.lane.b32.xlu1 %v310_v19, %s318_s17 }
 0x11a   :  { %151 = vrot.lane.b32.xlu1 %v310_v19, %s319_s18 }
 0x186   :  { %v164_v16 = vpop.permute.xlu1 %163  ;;  %v174_v20 = vpop.permute.xlu0 %173 }
 0x187   :  { %v166_v22 = vsub.f32 %v121_v13, %v164_v16  ;;  %v176_v24 = vsub.f32 %v121_v13, %v174_v20 }
 0x18b   :  { %v169_v21 = vpop.permute.xlu1 %168 }
 0x18c   :  { %v171_v23 = vsub.f32 %v121_v13, %v169_v21 }
 0x18e   :  { %v177_v25 = vsel %vm157_vm14, %v166_v22, %v171_v23 }
 0x18f   :  { %v179_v27 = vsel %vm178_vm15, %v177_v25, %v176_v24  ;;  %v141_v28 = vpop.permute.xlu1 %140 }
 0x190   :  { %181 = vst.msk [vmem:[%s473_s4] sm:$0x3] %vm180_vm0, %v179_v27  ;;  %v143_v29 = vmul.f32 %v141_v28, %v138_v26 }
 0x192   :  { %v144_v32 = vmul.f32 625.0, %v143_v29 }
 0x193   :  { %v152_v31 = vpop.permute.xlu1 %151 }
 0x194   :  { %v154_v33 = vmul.f32 %v152_v31, %v150_v30  ;;  %v145_v35 = vadd.f32 4.0, %v144_v32 }
 0x196   :  { %v155_v34 = vmul.f32 625.0, %v154_v33 }
 0x198   :  { %v156_v36 = vadd.f32 4.0, %v155_v34 }
 0x19a   :  { %v158_v37 = vsel %vm157_vm14, %v145_v35, %v156_v36 }
 0x19b   :  { %160 = vst.msk [vmem:[%s474_s3] sm:$0x3] %vm159_vm1, %v158_v37 }

</bundles_post_ra>
